<compile_context>
chip_gen: v7x
topology: tpu7x:2x2x1
jax: 0.10.0
libtpu: 0.0.40
codegen_flags: <defaults>
</compile_context>

<pallas_src>
import functools

import jax
import jax.numpy as jnp
from jax.experimental import pallas as pl
from jax.experimental.pallas import tpu as pltpu


# ----------------------------- fused kernels --------------------------------

def _convt_bn_relu_kernel(x_ref, w_ref, g_ref, gt_ref, gb_ref, o_ref,
                          *, inv_cnt, eps):
    """ConvTranspose2d (folded-phase matmul, bias dropped) + BatchNorm + ReLU.

    x_ref : (R, Kp)    bf16 im2col; rows (n, p, q), cols (phase, cin), zero-padded
    w_ref : (Kp, Mp)   bf16 folded weight; cols (sh, sw, cout), zero-padded
    g_ref : (Mp, Cout) f32 0/1 column -> channel group-sum matrix
    gt_ref: (Cout, Mp) f32 transpose (channel -> columns broadcast)
    gb_ref: (2, Cout)  f32 row0 = gamma, row1 = beta
    """
    y = jnp.dot(x_ref[...], w_ref[...],
                preferred_element_type=jnp.float32)                      # (R, Mp)

    # Per-channel batch statistics: ONE stacked group-sum dot.
    stats_m = jnp.concatenate(
        [jnp.sum(y, axis=0, keepdims=True),
         jnp.sum(y * y, axis=0, keepdims=True)], axis=0)                 # (2, Mp)
    stats_c = jnp.dot(stats_m, g_ref[...],
                      preferred_element_type=jnp.float32)                # (2, Cout)
    mean_c = stats_c[0:1, :] * inv_cnt
    var_c = jnp.maximum(stats_c[1:2, :] * inv_cnt - mean_c * mean_c, 0.0)
    scale_c = gb_ref[0:1, :] * jax.lax.rsqrt(var_c + eps)                # (1, Cout)
    shift_c = gb_ref[1:2, :] - mean_c * scale_c                          # (1, Cout)

    # ONE broadcast dot: per-channel affine -> per-column affine.
    aff_m = jnp.dot(jnp.concatenate([scale_c, shift_c], axis=0), gt_ref[...],
                    preferred_element_type=jnp.float32)                  # (2, Mp)
    o_ref[...] = jnp.maximum(y * aff_m[0:1, :] + aff_m[1:2, :], 0.0)


def _convt_tanh_kernel(x_ref, w_ref, b_ref, o_ref):
    """ConvTranspose2d (folded-phase matmul) + bias + Tanh."""
    y = jnp.dot(x_ref[...], w_ref[...],
                preferred_element_type=jnp.float32) + b_ref[...]
    o_ref[...] = jnp.tanh(y)


# ----------------------------- layout glue (XLA) ----------------------------

def _round_up(x, m):
    return (x + m - 1) // m * m


def _pad_to(a, shape):
    widths = [(0, t - s) for s, t in zip(a.shape, shape)]
    return jnp.pad(a, widths) if any(w[1] for w in widths) else a


def _im2col_phases(x_nhwc, Q):
    """(N, H, W, Cin) -> folded im2col (N*P*P, Q*Q*Cin), P = H + Q - 1."""
    N, H, W, Cin = x_nhwc.shape
    assert H == W
    P = H + Q - 1
    xp = jnp.pad(x_nhwc, ((0, 0), (Q - 1, Q - 1), (Q - 1, Q - 1), (0, 0)))
    cols = [xp[:, a:a + P, c:c + P, :].reshape(N * P * P, Cin)
            for a in range(Q) for c in range(Q)]
    return jnp.concatenate(cols, axis=1), P


def _fold_weight(w, S):
    """(Cin, Cout, K, K) -> (Q*Q*Cin, S*S*Cout); rows (phase, cin), cols (sh, sw, cout)."""
    Cin, Cout, K, _ = w.shape
    assert K % S == 0, "phase decomposition needs K % stride == 0"
    Q = K // S
    w_r = w.reshape(Cin, Cout, Q, S, Q, S)         # kh = qh*S + sh
    w_f = w_r[:, :, ::-1, :, ::-1, :]              # flip along qh / qw
    # -> (qh, qw, cin, sh, sw, cout): minor axis of the output is cout.
    return jnp.transpose(w_f, (2, 4, 0, 3, 5, 1)).reshape(Q * Q * Cin, S * S * Cout)


def _vmem_specs(n):
    return [pl.BlockSpec(memory_space=pltpu.MemorySpace.VMEM) for _ in range(n)]


# ----------------------------- layer wrappers --------------------------------

def convt_bn_relu_nhwc(x_nhwc, w, gamma, beta, stride):
    """ConvTranspose2d(stride, no pad, bias cancels) + BatchNorm2d + ReLU; NHWC -> NHWC."""
    N = x_nhwc.shape[0]
    Cin, Cout, K, _ = w.shape
    S = stride
    Q = K // S
    x_col, P = _im2col_phases(x_nhwc, Q)
    w_mat = _fold_weight(w, S)
    R, Kmm, M = N * P * P, Q * Q * Cin, Cout * S * S
    Kp, Mp = _round_up(Kmm, 128), _round_up(M, 128)
    OH = S * P                                     # == (H - 1) * S + K

    x_col = _pad_to(x_col, (R, Kp)).astype(jnp.bfloat16)
    w_mat = _pad_to(w_mat, (Kp, Mp)).astype(jnp.bfloat16)
    gt = _pad_to(jnp.tile(jnp.eye(Cout, dtype=jnp.float32), (1, S * S)),
                 (Cout, Mp))                       # (Cout, Mp), cols (sh, sw, cout)
    gb = jnp.stack([gamma, beta]).astype(jnp.float32)        # (2, Cout)

    kernel = functools.partial(_convt_bn_relu_kernel,
                               inv_cnt=1.0 / float(R * S * S), eps=1e-5)
    out2d = pl.pallas_call(
        kernel,
        out_shape=jax.ShapeDtypeStruct((R, Mp), jnp.float32),
        in_specs=_vmem_specs(5),
        out_specs=pl.BlockSpec(memory_space=pltpu.MemorySpace.VMEM),
    )(x_col, w_mat, gt.T, gt, gb)

    # rows = (n, p, q), cols = (sh, sw, cout); oh = S*p + sh, ow = S*q + sw.
    out6 = out2d[:, :M].reshape(N, P, P, S, S, Cout)
    return jnp.transpose(out6, (0, 1, 3, 2, 4, 5)).reshape(N, OH, OH, Cout)


def convt_tanh_nchw(x_nhwc, w, b, stride):
    """Final ConvTranspose2d(stride, no pad) + Tanh; NHWC in, NCHW out (matches PyTorch)."""
    N = x_nhwc.shape[0]
    Cin, Cout, K, _ = w.shape
    S = stride
    Q = K // S
    x_col, P = _im2col_phases(x_nhwc, Q)
    w_mat = _fold_weight(w, S)
    R, Kmm, M = N * P * P, Q * Q * Cin, Cout * S * S
    Kp, Mp = _round_up(Kmm, 128), _round_up(M, 128)
    OH = S * P

    x_col = _pad_to(x_col, (R, Kp)).astype(jnp.bfloat16)
    w_mat = _pad_to(w_mat, (Kp, Mp)).astype(jnp.bfloat16)
    b_row = _pad_to(jnp.tile(b, S * S).reshape(1, M), (1, Mp)).astype(jnp.float32)

    out2d = pl.pallas_call(
        _convt_tanh_kernel,
        out_shape=jax.ShapeDtypeStruct((R, Mp), jnp.float32),
        in_specs=_vmem_specs(3),
        out_specs=pl.BlockSpec(memory_space=pltpu.MemorySpace.VMEM),
    )(x_col, w_mat, b_row)

    out6 = out2d[:, :M].reshape(N, P, P, S, S, Cout)
    return jnp.transpose(out6, (0, 5, 1, 3, 2, 4)).reshape(N, Cout, OH, OH)


# ------------------------------- generator ----------------------------------

def init_generator_params(key, z_dim, hidden_units):
    ks = jax.random.split(key, 6)

    def w_init(k, cin, cout, ksz):
        scale = 1.0 / jnp.sqrt(float(cin * ksz * ksz))
        return scale * jax.random.normal(k, (cin, cout, ksz, ksz), jnp.float32)

    return dict(
        w1=w_init(ks[0], z_dim, hidden_units, 4),
        b1=0.01 * jax.random.normal(ks[1], (hidden_units,), jnp.float32),
        g1=jnp.ones((hidden_units,), jnp.float32),
        beta1=jnp.zeros((hidden_units,), jnp.float32),
        w2=w_init(ks[2], hidden_units, hidden_units // 2, 4),
        b2=0.01 * jax.random.normal(ks[3], (hidden_units // 2,), jnp.float32),
        g2=jnp.ones((hidden_units // 2,), jnp.float32),
        beta2=jnp.zeros((hidden_units // 2,), jnp.float32),
        w3=w_init(ks[4], hidden_units // 2, 1, 10),
        b3=0.01 * jax.random.normal(ks[5], (1,), jnp.float32),
    )


def generator_forward(noise, params, z_dim):
    # unsqueeze_noise (NHWC layout internally).  Conv biases b1/b2 are omitted:
    # they cancel exactly under the following BatchNorm mean subtraction.
    x = noise.reshape(noise.shape[0], 1, 1, z_dim)
    x = convt_bn_relu_nhwc(x, params["w1"], params["g1"], params["beta1"], 2)   # (N, 4, 4, HU)
    x = convt_bn_relu_nhwc(x, params["w2"], params["g2"], params["beta2"], 2)   # (N, 10, 10, HU/2)
    return convt_tanh_nchw(x, params["w3"], params["b3"], 2)                    # (N, 1, 28, 28)


# ------------------------------ pure-JAX reference ---------------------------

def _convt_ref(x, w, b, s):
    N, Cin, H, W = x.shape
    _, Cout, K, _ = w.shape
    OH = (H - 1) * s + K
    out = jnp.zeros((N, Cout, OH, OH), jnp.float32)
    for kh in range(K):
        for kw in range(K):
            contrib = jnp.einsum("ncij,cd->ndij", x, w[:, :, kh, kw],
                                 precision=jax.lax.Precision.HIGHEST)
            out = out.at[:, :, kh:kh + s * H:s, kw:kw + s * W:s].add(contrib)
    return out + b[None, :, None, None]


def _bn_relu_ref(x, g, beta, eps=1e-5):
    mean = x.mean(axis=(0, 2, 3), keepdims=True)
    var = jnp.square(x - mean).mean(axis=(0, 2, 3), keepdims=True)
    y = (x - mean) / jnp.sqrt(var + eps) * g[None, :, None, None] + beta[None, :, None, None]
    return jnp.maximum(y, 0.0)


def generator_ref(noise, params, z_dim):
    # Reference keeps the conv biases (as PyTorch does) to demonstrate that the
    # Pallas path's bias drop before BN is semantically identical.
    x = noise.reshape(noise.shape[0], z_dim, 1, 1)
    x = _bn_relu_ref(_convt_ref(x, params["w1"], params["b1"], 2),
                     params["g1"], params["beta1"])
    x = _bn_relu_ref(_convt_ref(x, params["w2"], params["b2"], 2),
                     params["g2"], params["beta2"])
    return jnp.tanh(_convt_ref(x, params["w3"], params["b3"], 2))


if __name__ == "__main__":
    Z, HU, N = 16, 32, 2                      # small shapes: z_dim=16, hidden=32, batch=2
    key = jax.random.PRNGKey(0)
    pkey, nkey = jax.random.split(key)
    params = init_generator_params(pkey, Z, HU)
    noise = jax.random.normal(nkey, (N, Z), jnp.float32)

    fwd = jax.jit(generator_forward, static_argnums=2)
    out = jax.block_until_ready(fwd(noise, params, Z))
    assert out.shape == (N, 1, 28, 28), out.shape
    assert bool(jnp.all(jnp.isfinite(out)))

    ref = jax.block_until_ready(generator_ref(noise, params, Z))
    err = float(jnp.max(jnp.abs(out - ref)))
    # Tolerance sized for single-pass bf16-input MXU matmuls compounded over
    # three layers vs. an f32 Precision.HIGHEST reference.
    assert bool(jnp.allclose(out, ref, atol=3e-2, rtol=3e-2)), f"max abs err {err}"

    print("KERNEL_OK")
</pallas_src>

<mosaic_0001>
module attributes {stable_mosaic.version = 11 : i64} {
  func.func @_convt_bn_relu_kernel(%arg0: memref<8x128xbf16, #tpu.memory_space<vmem>>, %arg1: memref<128x128xbf16, #tpu.memory_space<vmem>>, %arg2: memref<128x32xf32, #tpu.memory_space<vmem>>, %arg3: memref<32x128xf32, #tpu.memory_space<vmem>>, %arg4: memref<2x32xf32, #tpu.memory_space<vmem>>, %arg5: memref<8x128xf32, #tpu.memory_space<vmem>>) attributes {dimension_semantics = [], scalar_prefetch = 0 : i64, scratch_operands = 0 : i64, tpu.core_type = #tpu.core_type<tc>} {
    %c0 = arith.constant 0 : index
    %c0_0 = arith.constant 0 : index
    %0 = vector.load %arg0[%c0, %c0_0] : memref<8x128xbf16, #tpu.memory_space<vmem>>, vector<8x128xbf16>
    %c0_1 = arith.constant 0 : index
    %c0_2 = arith.constant 0 : index
    %1 = vector.load %arg1[%c0_1, %c0_2] : memref<128x128xbf16, #tpu.memory_space<vmem>>, vector<128x128xbf16>
    %cst = arith.constant dense<0.000000e+00> : vector<8x128xf32>
    %2 = tpu.matmul %0, %1, %cst {dimension_numbers = #tpu.dot_dimension_numbers<[1], [0], [0], [1], [0, 0, 1, 1], [], []>} : vector<8x128xbf16>, vector<128x128xbf16>, vector<8x128xf32> -> vector<8x128xf32>
    %cst_3 = arith.constant dense<0.000000e+00> : vector<128xf32>
    %3 = vector.multi_reduction <add>, %2, %cst_3 [0] : vector<8x128xf32> to vector<128xf32>
    %4 = vector.shape_cast %3 : vector<128xf32> to vector<1x128xf32>
    %5 = arith.mulf %2, %2 : vector<8x128xf32>
    %cst_4 = arith.constant dense<0.000000e+00> : vector<128xf32>
    %6 = vector.multi_reduction <add>, %5, %cst_4 [0] : vector<8x128xf32> to vector<128xf32>
    %7 = vector.shape_cast %6 : vector<128xf32> to vector<1x128xf32>
    %8 = tpu.concatenate %4, %7 in 0 : vector<1x128xf32>, vector<1x128xf32> -> vector<2x128xf32>
    %c0_5 = arith.constant 0 : index
    %c0_6 = arith.constant 0 : index
    %9 = vector.load %arg2[%c0_5, %c0_6] : memref<128x32xf32, #tpu.memory_space<vmem>>, vector<128x32xf32>
    %cst_7 = arith.constant dense<0.000000e+00> : vector<2x32xf32>
    %10 = tpu.matmul %8, %9, %cst_7 {dimension_numbers = #tpu.dot_dimension_numbers<[1], [0], [0], [1], [0, 0, 1, 1], [], []>} : vector<2x128xf32>, vector<128x32xf32>, vector<2x32xf32> -> vector<2x32xf32>
    %11 = vector.extract_strided_slice %10 {offsets = [0, 0], sizes = [1, 32], strides = [1, 1]} : vector<2x32xf32> to vector<1x32xf32>
    %cst_8 = arith.constant 3.125000e-02 : f32
    %12 = vector.broadcast %cst_8 : f32 to vector<1x32xf32>
    %13 = arith.mulf %11, %12 : vector<1x32xf32>
    %14 = vector.extract_strided_slice %10 {offsets = [1, 0], sizes = [1, 32], strides = [1, 1]} : vector<2x32xf32> to vector<1x32xf32>
    %cst_9 = arith.constant 3.125000e-02 : f32
    %15 = vector.broadcast %cst_9 : f32 to vector<1x32xf32>
    %16 = arith.mulf %14, %15 : vector<1x32xf32>
    %17 = arith.mulf %13, %13 : vector<1x32xf32>
    %18 = arith.subf %16, %17 : vector<1x32xf32>
    %cst_10 = arith.constant 0.000000e+00 : f32
    %19 = vector.broadcast %cst_10 : f32 to vector<1x32xf32>
    %20 = arith.maximumf %18, %19 : vector<1x32xf32>
    %c0_11 = arith.constant 0 : index
    %c0_12 = arith.constant 0 : index
    %21 = vector.load %arg4[%c0_11, %c0_12] : memref<2x32xf32, #tpu.memory_space<vmem>>, vector<1x32xf32>
    %cst_13 = arith.constant 9.99999974E-6 : f32
    %22 = vector.broadcast %cst_13 : f32 to vector<1x32xf32>
    %23 = arith.addf %20, %22 : vector<1x32xf32>
    %24 = math.rsqrt %23 : vector<1x32xf32>
    %25 = arith.mulf %21, %24 : vector<1x32xf32>
    %c1 = arith.constant 1 : index
    %c0_14 = arith.constant 0 : index
    %26 = vector.load %arg4[%c1, %c0_14] : memref<2x32xf32, #tpu.memory_space<vmem>>, vector<1x32xf32>
    %27 = arith.mulf %13, %25 : vector<1x32xf32>
    %28 = arith.subf %26, %27 : vector<1x32xf32>
    %29 = tpu.concatenate %25, %28 in 0 : vector<1x32xf32>, vector<1x32xf32> -> vector<2x32xf32>
    %c0_15 = arith.constant 0 : index
    %c0_16 = arith.constant 0 : index
    %30 = vector.load %arg3[%c0_15, %c0_16] : memref<32x128xf32, #tpu.memory_space<vmem>>, vector<32x128xf32>
    %cst_17 = arith.constant dense<0.000000e+00> : vector<2x128xf32>
    %31 = tpu.matmul %29, %30, %cst_17 {dimension_numbers = #tpu.dot_dimension_numbers<[1], [0], [0], [1], [0, 0, 1, 1], [], []>} : vector<2x32xf32>, vector<32x128xf32>, vector<2x128xf32> -> vector<2x128xf32>
    %32 = vector.extract_strided_slice %31 {offsets = [0, 0], sizes = [1, 128], strides = [1, 1]} : vector<2x128xf32> to vector<1x128xf32>
    %33 = vector.broadcast %32 : vector<1x128xf32> to vector<8x128xf32>
    %34 = arith.mulf %2, %33 : vector<8x128xf32>
    %35 = vector.extract_strided_slice %31 {offsets = [1, 0], sizes = [1, 128], strides = [1, 1]} : vector<2x128xf32> to vector<1x128xf32>
    %36 = vector.broadcast %35 : vector<1x128xf32> to vector<8x128xf32>
    %37 = arith.addf %34, %36 : vector<8x128xf32>
    %cst_18 = arith.constant 0.000000e+00 : f32
    %38 = vector.broadcast %cst_18 : f32 to vector<8x128xf32>
    %39 = arith.maximumf %37, %38 : vector<8x128xf32>
    %c0_19 = arith.constant 0 : index
    %c0_20 = arith.constant 0 : index
    %40 = vector.load %arg5[%c0_19, %c0_20] : memref<8x128xf32, #tpu.memory_space<vmem>>, vector<8x128xf32>
    tpu.vector_store %arg5[%c0_19, %c0_20], %39 {strides = array<i32>} : memref<8x128xf32, #tpu.memory_space<vmem>>, vector<8x128xf32>,
    return
  }
}

module attributes {stable_mosaic.version = 11 : i64} {
  func.func @_convt_bn_relu_kernel(%arg0: memref<50x128xbf16, #tpu.memory_space<vmem>>, %arg1: memref<128x128xbf16, #tpu.memory_space<vmem>>, %arg2: memref<128x16xf32, #tpu.memory_space<vmem>>, %arg3: memref<16x128xf32, #tpu.memory_space<vmem>>, %arg4: memref<2x16xf32, #tpu.memory_space<vmem>>, %arg5: memref<50x128xf32, #tpu.memory_space<vmem>>) attributes {dimension_semantics = [], scalar_prefetch = 0 : i64, scratch_operands = 0 : i64, tpu.core_type = #tpu.core_type<tc>} {
    %c0 = arith.constant 0 : index
    %c0_0 = arith.constant 0 : index
    %0 = vector.load %arg0[%c0, %c0_0] : memref<50x128xbf16, #tpu.memory_space<vmem>>, vector<50x128xbf16>
    %c0_1 = arith.constant 0 : index
    %c0_2 = arith.constant 0 : index
    %1 = vector.load %arg1[%c0_1, %c0_2] : memref<128x128xbf16, #tpu.memory_space<vmem>>, vector<128x128xbf16>
    %cst = arith.constant dense<0.000000e+00> : vector<50x128xf32>
    %2 = tpu.matmul %0, %1, %cst {dimension_numbers = #tpu.dot_dimension_numbers<[1], [0], [0], [1], [0, 0, 1, 1], [], []>} : vector<50x128xbf16>, vector<128x128xbf16>, vector<50x128xf32> -> vector<50x128xf32>
    %cst_3 = arith.constant dense<0.000000e+00> : vector<128xf32>
    %3 = vector.multi_reduction <add>, %2, %cst_3 [0] : vector<50x128xf32> to vector<128xf32>
    %4 = vector.shape_cast %3 : vector<128xf32> to vector<1x128xf32>
    %5 = arith.mulf %2, %2 : vector<50x128xf32>
    %cst_4 = arith.constant dense<0.000000e+00> : vector<128xf32>
    %6 = vector.multi_reduction <add>, %5, %cst_4 [0] : vector<50x128xf32> to vector<128xf32>
    %7 = vector.shape_cast %6 : vector<128xf32> to vector<1x128xf32>
    %8 = tpu.concatenate %4, %7 in 0 : vector<1x128xf32>, vector<1x128xf32> -> vector<2x128xf32>
    %c0_5 = arith.constant 0 : index
    %c0_6 = arith.constant 0 : index
    %9 = vector.load %arg2[%c0_5, %c0_6] : memref<128x16xf32, #tpu.memory_space<vmem>>, vector<128x16xf32>
    %cst_7 = arith.constant dense<0.000000e+00> : vector<2x16xf32>
    %10 = tpu.matmul %8, %9, %cst_7 {dimension_numbers = #tpu.dot_dimension_numbers<[1], [0], [0], [1], [0, 0, 1, 1], [], []>} : vector<2x128xf32>, vector<128x16xf32>, vector<2x16xf32> -> vector<2x16xf32>
    %11 = vector.extract_strided_slice %10 {offsets = [0, 0], sizes = [1, 16], strides = [1, 1]} : vector<2x16xf32> to vector<1x16xf32>
    %cst_8 = arith.constant 5.000000e-03 : f32
    %12 = vector.broadcast %cst_8 : f32 to vector<1x16xf32>
    %13 = arith.mulf %11, %12 : vector<1x16xf32>
    %14 = vector.extract_strided_slice %10 {offsets = [1, 0], sizes = [1, 16], strides = [1, 1]} : vector<2x16xf32> to vector<1x16xf32>
    %cst_9 = arith.constant 5.000000e-03 : f32
    %15 = vector.broadcast %cst_9 : f32 to vector<1x16xf32>
    %16 = arith.mulf %14, %15 : vector<1x16xf32>
    %17 = arith.mulf %13, %13 : vector<1x16xf32>
    %18 = arith.subf %16, %17 : vector<1x16xf32>
    %cst_10 = arith.constant 0.000000e+00 : f32
    %19 = vector.broadcast %cst_10 : f32 to vector<1x16xf32>
    %20 = arith.maximumf %18, %19 : vector<1x16xf32>
    %c0_11 = arith.constant 0 : index
    %c0_12 = arith.constant 0 : index
    %21 = vector.load %arg4[%c0_11, %c0_12] : memref<2x16xf32, #tpu.memory_space<vmem>>, vector<1x16xf32>
    %cst_13 = arith.constant 9.99999974E-6 : f32
    %22 = vector.broadcast %cst_13 : f32 to vector<1x16xf32>
    %23 = arith.addf %20, %22 : vector<1x16xf32>
    %24 = math.rsqrt %23 : vector<1x16xf32>
    %25 = arith.mulf %21, %24 : vector<1x16xf32>
    %c1 = arith.constant 1 : index
    %c0_14 = arith.constant 0 : index
    %26 = vector.load %arg4[%c1, %c0_14] : memref<2x16xf32, #tpu.memory_space<vmem>>, vector<1x16xf32>
    %27 = arith.mulf %13, %25 : vector<1x16xf32>
    %28 = arith.subf %26, %27 : vector<1x16xf32>
    %29 = tpu.concatenate %25, %28 in 0 : vector<1x16xf32>, vector<1x16xf32> -> vector<2x16xf32>
    %c0_15 = arith.constant 0 : index
    %c0_16 = arith.constant 0 : index
    %30 = vector.load %arg3[%c0_15, %c0_16] : memref<16x128xf32, #tpu.memory_space<vmem>>, vector<16x128xf32>
    %cst_17 = arith.constant dense<0.000000e+00> : vector<2x128xf32>
    %31 = tpu.matmul %29, %30, %cst_17 {dimension_numbers = #tpu.dot_dimension_numbers<[1], [0], [0], [1], [0, 0, 1, 1], [], []>} : vector<2x16xf32>, vector<16x128xf32>, vector<2x128xf32> -> vector<2x128xf32>
    %32 = vector.extract_strided_slice %31 {offsets = [0, 0], sizes = [1, 128], strides = [1, 1]} : vector<2x128xf32> to vector<1x128xf32>
    %33 = vector.broadcast %32 : vector<1x128xf32> to vector<50x128xf32>
    %34 = arith.mulf %2, %33 : vector<50x128xf32>
    %35 = vector.extract_strided_slice %31 {offsets = [1, 0], sizes = [1, 128], strides = [1, 1]} : vector<2x128xf32> to vector<1x128xf32>
    %36 = vector.broadcast %35 : vector<1x128xf32> to vector<50x128xf32>
    %37 = arith.addf %34, %36 : vector<50x128xf32>
    %cst_18 = arith.constant 0.000000e+00 : f32
    %38 = vector.broadcast %cst_18 : f32 to vector<50x128xf32>
    %39 = arith.maximumf %37, %38 : vector<50x128xf32>
    %c0_19 = arith.constant 0 : index
    %c0_20 = arith.constant 0 : index
    %40 = vector.load %arg5[%c0_19, %c0_20] : memref<50x128xf32, #tpu.memory_space<vmem>>, vector<50x128xf32>
    tpu.vector_store %arg5[%c0_19, %c0_20], %39 {strides = array<i32>} : memref<50x128xf32, #tpu.memory_space<vmem>>, vector<50x128xf32>,
    return
  }
}

module attributes {stable_mosaic.version = 11 : i64} {
  func.func @_convt_tanh_kernel(%arg0: memref<392x512xbf16, #tpu.memory_space<vmem>>, %arg1: memref<512x128xbf16, #tpu.memory_space<vmem>>, %arg2: memref<1x128xf32, #tpu.memory_space<vmem>>, %arg3: memref<392x128xf32, #tpu.memory_space<vmem>>) attributes {dimension_semantics = [], scalar_prefetch = 0 : i64, scratch_operands = 0 : i64, tpu.core_type = #tpu.core_type<tc>} {
    %c0 = arith.constant 0 : index
    %c0_0 = arith.constant 0 : index
    %0 = vector.load %arg0[%c0, %c0_0] : memref<392x512xbf16, #tpu.memory_space<vmem>>, vector<392x512xbf16>
    %c0_1 = arith.constant 0 : index
    %c0_2 = arith.constant 0 : index
    %1 = vector.load %arg1[%c0_1, %c0_2] : memref<512x128xbf16, #tpu.memory_space<vmem>>, vector<512x128xbf16>
    %cst = arith.constant dense<0.000000e+00> : vector<392x128xf32>
    %2 = tpu.matmul %0, %1, %cst {dimension_numbers = #tpu.dot_dimension_numbers<[1], [0], [0], [1], [0, 0, 1, 1], [], []>} : vector<392x512xbf16>, vector<512x128xbf16>, vector<392x128xf32> -> vector<392x128xf32>
    %c0_3 = arith.constant 0 : index
    %c0_4 = arith.constant 0 : index
    %3 = vector.load %arg2[%c0_3, %c0_4] : memref<1x128xf32, #tpu.memory_space<vmem>>, vector<1x128xf32>
    %4 = vector.broadcast %3 : vector<1x128xf32> to vector<392x128xf32>
    %5 = arith.addf %2, %4 : vector<392x128xf32>
    %6 = math.tanh %5 : vector<392x128xf32>
    %c0_5 = arith.constant 0 : index
    %c0_6 = arith.constant 0 : index
    %7 = vector.load %arg3[%c0_5, %c0_6] : memref<392x128xf32, #tpu.memory_space<vmem>>, vector<392x128xf32>
    tpu.vector_store %arg3[%c0_5, %c0_6], %6 {strides = array<i32>} : memref<392x128xf32, #tpu.memory_space<vmem>>, vector<392x128xf32>,
    return
  }
}

</mosaic_0001>

<bundles_post_ra>
// kernel: tile.19
= control target key start
LH: loop header
LB: loop body
LE: loop exit
PB: predicated region body
PF: predicated region fallthrough
CT: control target
= control target key end

     0   :  { %vm162_vm0 = vcmask 1047556   ;;  %s398_s10 = smov 96   ;;  %vm164_vm1 = vcmask 261120   ;;  %s400_s21 = smov 32   ;;  %vm201_vm2 = vcmask 1048320   ;;  %vm244_vm3 = vcmask 785920   ;;  %s579_s0 = inlined_call_operand.vmem [shape: f32[32,4,32], index: 0, kind: input, shape index: {}]   ;;  %s580_s1 = inlined_call_operand.vmem [shape: f32[32,128], index: 1, kind: output, shape index: {}]  }
   0x1   :  { %v376_v0 = vld [vmem:[%s579_s0 + $0x1c] sm:$0xf]  ;;  %v377_v1 = vld [vmem:[%s579_s0 + $0x18] sm:$0xf]  ;;  %v378_v2 = vld [vmem:[%s579_s0 + $0x14] sm:$0xf] }
   0x2   :  { %128 = vst [vmem:[#allocation0 + $0x38] sm:$0xf] %v376_v0  ;;  %133 = vst [vmem:[#allocation0 + $0x30] sm:$0xf] %v377_v1  ;;  %v379_v3 = vld [vmem:[%s579_s0 + $0x10] sm:$0xf] }
   0x3   :  { %138 = vst [vmem:[#allocation0 + $0x28] sm:$0xf] %v378_v2  ;;  %v380_v4 = vld [vmem:[%s579_s0 + $0xc] sm:$0xf]  ;;  %v381_v5 = vld [vmem:[%s579_s0 + $0x8] sm:$0xf] }
   0x4   :  { %143 = vst [vmem:[#allocation0 + $0x20] sm:$0xf] %v379_v3  ;;  %148 = vst [vmem:[#allocation0 + $0x18] sm:$0xf] %v380_v4  ;;  %v382_v6 = vld [vmem:[%s579_s0 + $0x4] sm:$0xf] }
   0x5   :  { %153 = vst [vmem:[#allocation0 + $0x10] sm:$0xf] %v381_v5  ;;  %v158_v7 = vld [vmem:[%s579_s0] sm:$0xf]  ;;  %157 = vst [vmem:[#allocation0 + $0x8] sm:$0xf] %v382_v6 }
   0x6   :  { %159 = vst [vmem:[#allocation0] sm:$0xf] %v158_v7  ;;  %v360_v8 = vld [vmem:[%s579_s0 + $0x5c] sm:$0xf]  ;;  %v361_v9 = vld [vmem:[%s579_s0 + $0x58] sm:$0xf] }
   0x7   :  { %v362_v10 = vld [vmem:[%s579_s0 + $0x54] sm:$0xf]  ;;  %48 = vst [vmem:[#allocation0 + $0xb8] sm:$0xf] %v360_v8  ;;  %53 = vst [vmem:[#allocation0 + $0xb0] sm:$0xf] %v361_v9 }
   0x8   :  { %58 = vst [vmem:[#allocation0 + $0xa8] sm:$0xf] %v362_v10  ;;  %v363_v11 = vld [vmem:[%s579_s0 + $0x50] sm:$0xf]  ;;  %v364_v12 = vld [vmem:[%s579_s0 + $0x4c] sm:$0xf] }
   0x9   :  { %v365_v13 = vld [vmem:[%s579_s0 + $0x48] sm:$0xf]  ;;  %63 = vst [vmem:[#allocation0 + $0xa0] sm:$0xf] %v363_v11  ;;  %68 = vst [vmem:[#allocation0 + $0x98] sm:$0xf] %v364_v12 }
   0xa   :  { %73 = vst [vmem:[#allocation0 + $0x90] sm:$0xf] %v365_v13  ;;  %v366_v14 = vld [vmem:[%s579_s0 + $0x44] sm:$0xf]  ;;  %v367_v15 = vld [vmem:[%s579_s0 + $0x40] sm:$0xf] }
   0xb   :  { %v368_v16 = vld [vmem:[%s579_s0 + $0x3c] sm:$0xf]  ;;  %78 = vst [vmem:[#allocation0 + $0x88] sm:$0xf] %v366_v14  ;;  %83 = vst [vmem:[#allocation0 + $0x80] sm:$0xf] %v367_v15 }
   0xc   :  { %88 = vst [vmem:[#allocation0 + $0x78] sm:$0xf] %v368_v16  ;;  %v369_v17 = vld [vmem:[%s579_s0 + $0x38] sm:$0xf]  ;;  %v370_v18 = vld [vmem:[%s579_s0 + $0x34] sm:$0xf] }
   0xd   :  { %v371_v19 = vld [vmem:[%s579_s0 + $0x30] sm:$0xf]  ;;  %93 = vst [vmem:[#allocation0 + $0x70] sm:$0xf] %v369_v17  ;;  %98 = vst [vmem:[#allocation0 + $0x68] sm:$0xf] %v370_v18 }
   0xe   :  { %103 = vst [vmem:[#allocation0 + $0x60] sm:$0xf] %v371_v19  ;;  %v372_v20 = vld [vmem:[%s579_s0 + $0x2c] sm:$0xf]  ;;  %v373_v21 = vld [vmem:[%s579_s0 + $0x28] sm:$0xf] }
   0xf   :  { %v374_v22 = vld [vmem:[%s579_s0 + $0x24] sm:$0xf]  ;;  %108 = vst [vmem:[#allocation0 + $0x58] sm:$0xf] %v372_v20  ;;  %113 = vst [vmem:[#allocation0 + $0x50] sm:$0xf] %v373_v21 }
  0x10   :  { %118 = vst [vmem:[#allocation0 + $0x48] sm:$0xf] %v374_v22  ;;  %v375_v23 = vld [vmem:[%s579_s0 + $0x20] sm:$0xf]  ;;  %v352_v24 = vld [vmem:[%s579_s0 + $0x7c] sm:$0xf] }
  0x11   :  { %v353_v25 = vld [vmem:[%s579_s0 + $0x78] sm:$0xf]  ;;  %123 = vst [vmem:[#allocation0 + $0x40] sm:$0xf] %v375_v23  ;;  %8 = vst [vmem:[#allocation0 + $0xf8] sm:$0xf] %v352_v24 }
  0x12   :  { %v196_v26 = vld [vmem:[#allocation0 + $0x3] ss:$8 sm:$0xf0]   ;;  %13 = vst [vmem:[#allocation0 + $0xf0] sm:$0xf] %v353_v25  ;;  %vm287_vm4 = vcmask 523520  }
  0x13   :  { %v354_v27 = vld [vmem:[%s579_s0 + $0x74] sm:$0xf]  ;;  %v194_v28 = vld [vmem:[#allocation0 + $0x3] ss:$8 sm:$0xf]  }
  0x14   :  { %18 = vst [vmem:[#allocation0 + $0xe8] sm:$0xf] %v354_v27  ;;  %v355_v29 = vld [vmem:[%s579_s0 + $0x70] sm:$0xf]  ;;  %v198_v30 = vsel %vm162_vm0, %v196_v26, %v194_v28  ;;  %v356_v31 = vld [vmem:[%s579_s0 + $0x6c] sm:$0xf] }
  0x15   :  { %23 = vst [vmem:[#allocation0 + $0xe0] sm:$0xf] %v355_v29  ;;  %v357_v32 = vld [vmem:[%s579_s0 + $0x68] sm:$0xf]  ;;  %v358_v33 = vld [vmem:[%s579_s0 + $0x64] sm:$0xf]  ;;  %199 = vrot.lane.b32.xlu0 %v198_v30, %s398_s10 }
  0x16   :  { %v217_v34 = vld [vmem:[#allocation0 + $0x83] ss:$8 sm:$0xf0]   ;;  %28 = vst [vmem:[#allocation0 + $0xd8] sm:$0xf] %v356_v31 }
  0x17   :  { %33 = vst [vmem:[#allocation0 + $0xd0] sm:$0xf] %v357_v32  ;;  %38 = vst [vmem:[#allocation0 + $0xc8] sm:$0xf] %v358_v33  ;;  %v359_v35 = vld [vmem:[%s579_s0 + $0x60] sm:$0xf] }
  0x18   :  { %v215_v36 = vld [vmem:[#allocation0 + $0x83] ss:$8 sm:$0xf]   ;;  %43 = vst [vmem:[#allocation0 + $0xc0] sm:$0xf] %v359_v35  ;;  %s399_s0 = smov 64  }
  0x19   :  { %v219_v37 = vsel %vm162_vm0, %v217_v34, %v215_v36  ;;  %v206_v38 = vld [vmem:[#allocation0 + $0x43] ss:$8 sm:$0xf0]   ;;  %v237_v39 = vld [vmem:[#allocation0 + $0x2] ss:$8 sm:$0xf]  }
  0x1a   :  { %220 = vrot.lane.b32.xlu1 %v219_v37, %s398_s10  ;;  %v204_v40 = vld [vmem:[#allocation0 + $0x43] ss:$8 sm:$0xf]   ;;  %v239_v41 = vld [vmem:[#allocation0 + $0x2] ss:$8 sm:$0xf0]  }
  0x1b   :  { %v208_v42 = vsel %vm162_vm0, %v206_v38, %v204_v40  ;;  %v249_v44 = vld [vmem:[#allocation0 + $0x42] ss:$8 sm:$0xf0]   ;;  %v241_v45 = vsel %vm162_vm0, %v239_v41, %v237_v39  ;;  %v280_v52 = vld [vmem:[#allocation0 + $0x1] ss:$8 sm:$0xf]  }
  0x1c   :  { %209 = vrot.lane.b32.xlu0 %v208_v42, %s398_s10  ;;  %v228_v43 = vld [vmem:[#allocation0 + $0xc3] ss:$8 sm:$0xf0]   ;;  %v247_v46 = vld [vmem:[#allocation0 + $0x42] ss:$8 sm:$0xf]  }
  0x1d   :  { %v258_v47 = vld [vmem:[#allocation0 + $0x82] ss:$8 sm:$0xf]   ;;  %v251_v53 = vsel %vm162_vm0, %v249_v44, %v247_v46  ;;  %v282_v55 = vld [vmem:[#allocation0 + $0x1] ss:$8 sm:$0xf0]  }
  0x1e   :  { %v260_v49 = vld [vmem:[#allocation0 + $0x82] ss:$8 sm:$0xf0]   ;;  %v160_v56 = vld [vmem:[#allocation0] ss:$8 sm:$0xf]   ;;  %v284_v4 = vsel %vm162_vm0, %v282_v55, %v280_v52 }
  0x1f   :  { %v226_v48 = vld [vmem:[#allocation0 + $0xc3] ss:$8 sm:$0xf]   ;;  %v271_v51 = vld [vmem:[#allocation0 + $0xc2] ss:$8 sm:$0xf0]   ;;  %v262_v54 = vsel %vm162_vm0, %v260_v49, %v258_v47 }
  0x20   :  { %v230_v50 = vsel %vm162_vm0, %v228_v43, %v226_v48  ;;  %242 = vrot.lane.b32.xlu0 %v241_v45, %s399_s0  ;;  %v269_v57 = vld [vmem:[#allocation0 + $0xc2] ss:$8 sm:$0xf]   ;;  %v161_v58 = vld [vmem:[#allocation0] ss:$8 sm:$0xf0]  }
  0x21   :  { %231 = vrot.lane.b32.xlu1 %v230_v50, %s398_s10  ;;  %v163_v59 = vsel %vm162_vm0, %v161_v58, %v160_v56  ;;  %v176_v60 = vld [vmem:[#allocation0 + $0x80] ss:$8 sm:$0xf]   ;;  %v290_v62 = vld [vmem:[#allocation0 + $0x41] ss:$8 sm:$0xf]   ;;  %v273_v3 = vsel %vm162_vm0, %v271_v51, %v269_v57 }
  0x22   :  { %v178_v61 = vld [vmem:[#allocation0 + $0x80] ss:$8 sm:$0xf0]   ;;  %v292_v63 = vld [vmem:[#allocation0 + $0x41] ss:$8 sm:$0xf0]  }
  0x23   :  { %165 = vst.msk [vmem:[%s580_s1] sm:$0xff] %vm164_vm1, %v163_v59   ;;  %v180_v0 = vsel %vm162_vm0, %v178_v61, %v176_v60  ;;  %v167_v1 = vld [vmem:[#allocation0 + $0x40] ss:$8 sm:$0xf]   ;;  %v294_v11 = vsel %vm162_vm0, %v292_v63, %v290_v62 }
  0x24   :  { %263 = vrot.lane.b32.xlu0 %v262_v54, %s399_s0  ;;  %v169_v2 = vld [vmem:[#allocation0 + $0x40] ss:$8 sm:$0xf0]   ;;  %384 = vst.msk [vmem:[%s580_s1 + $0x10] sm:$0xff] %vm164_vm1, %v180_v0  }
  0x25   :  { %252 = vrot.lane.b32.xlu1 %v251_v53, %s399_s0  ;;  %v171_v5 = vsel %vm162_vm0, %v169_v2, %v167_v1  ;;  %v185_v6 = vld [vmem:[#allocation0 + $0xc0] ss:$8 sm:$0xf]   ;;  %v301_v8 = vld [vmem:[#allocation0 + $0x81] ss:$8 sm:$0xf]  }
  0x26   :  { %v187_v7 = vld [vmem:[#allocation0 + $0xc0] ss:$8 sm:$0xf0]   ;;  %v303_v9 = vld [vmem:[#allocation0 + $0x81] ss:$8 sm:$0xf0]  }
  0x27   :  { %383 = vst.msk [vmem:[%s580_s1 + $0x8] sm:$0xff] %vm164_vm1, %v171_v5   ;;  %v189_v10 = vsel %vm162_vm0, %v187_v7, %v185_v6  ;;  %v305_v12 = vsel %vm162_vm0, %v303_v9, %v301_v8  ;;  %v312_v13 = vld [vmem:[#allocation0 + $0xc1] ss:$8 sm:$0xf]  }
  0x28   :  { %385 = vst.msk [vmem:[%s580_s1 + $0x18] sm:$0xff] %vm164_vm1, %v189_v10   ;;  %285 = vrot.lane.b32.xlu0 %v284_v4, %s400_s21  ;;  %v314_v14 = vld [vmem:[#allocation0 + $0xc1] ss:$8 sm:$0xf0]  }
  0x29   :  { %274 = vrot.lane.b32.xlu1 %v273_v3, %s399_s0  ;;  %v316_v15 = vsel %vm162_vm0, %v314_v14, %v312_v13 }
  0x2c   :  { %306 = vrot.lane.b32.xlu0 %v305_v12, %s400_s21 }
  0x2d   :  { %295 = vrot.lane.b32.xlu1 %v294_v11, %s400_s21 }
  0x31   :  { %317 = vrot.lane.b32.xlu1 %v316_v15, %s400_s21 }
  0x87   :  { %v200_v16 = vpop.permute.xlu0 %199  }
  0x88   :  { %202 = vst.msk [vmem:[%s580_s1] sm:$0xff] %vm201_vm2, %v200_v16  }
  0x8c   :  { %v221_v17 = vpop.permute.xlu1 %220  }
  0x8d   :  { %387 = vst.msk [vmem:[%s580_s1 + $0x10] sm:$0xff] %vm201_vm2, %v221_v17  }
  0x8e   :  { %v210_v18 = vpop.permute.xlu0 %209  }
  0x8f   :  { %386 = vst.msk [vmem:[%s580_s1 + $0x8] sm:$0xff] %vm201_vm2, %v210_v18  }
  0x92   :  { %v243_v20 = vpop.permute.xlu0 %242  }
  0x93   :  { %v232_v19 = vpop.permute.xlu1 %231   ;;  %245 = vst.msk [vmem:[%s580_s1] sm:$0xff] %vm244_vm3, %v243_v20  }
  0x94   :  { %388 = vst.msk [vmem:[%s580_s1 + $0x18] sm:$0xff] %vm201_vm2, %v232_v19  }
  0x96   :  { %v264_v22 = vpop.permute.xlu0 %263  }
  0x97   :  { %v253_v21 = vpop.permute.xlu1 %252   ;;  %390 = vst.msk [vmem:[%s580_s1 + $0x10] sm:$0xff] %vm244_vm3, %v264_v22  }
  0x98   :  { %389 = vst.msk [vmem:[%s580_s1 + $0x8] sm:$0xff] %vm244_vm3, %v253_v21  }
  0x9a   :  { %v286_v24 = vpop.permute.xlu0 %285  }
  0x9b   :  { %v275_v23 = vpop.permute.xlu1 %274   ;;  %288 = vst.msk [vmem:[%s580_s1] sm:$0xff] %vm287_vm4, %v286_v24  }
  0x9c   :  { %391 = vst.msk [vmem:[%s580_s1 + $0x18] sm:$0xff] %vm244_vm3, %v275_v23  }
  0x9e   :  { %v307_v26 = vpop.permute.xlu0 %306  }
  0x9f   :  { %v296_v25 = vpop.permute.xlu1 %295   ;;  %393 = vst.msk [vmem:[%s580_s1 + $0x10] sm:$0xff] %vm287_vm4, %v307_v26  }
  0xa0   :  { %392 = vst.msk [vmem:[%s580_s1 + $0x8] sm:$0xff] %vm287_vm4, %v296_v25  }
  0xa3   :  { %v318_v27 = vpop.permute.xlu1 %317  }
  0xa4   :  { %394 = vst.msk [vmem:[%s580_s1 + $0x18] sm:$0xff] %vm287_vm4, %v318_v27  }

// kernel: tile.24
= control target key start
LH: loop header
LB: loop body
LE: loop exit
PB: predicated region body
PF: predicated region fallthrough
CT: control target
= control target key end

     0   :  { %vm82_vm0 = vcmask 1047556   ;;  %vm84_vm1 = vcmask 130048   ;;  %s195_s9 = smov 48   ;;  %s196_s14 = smov 16   ;;  %vm103_vm2 = vcmask 523648   ;;  %vm124_vm3 = vcmask 392448   ;;  %s289_s0 = inlined_call_operand.vmem [shape: f32[16,4,16], index: 0, kind: input, shape index: {}]   ;;  %s290_s1 = inlined_call_operand.vmem [shape: f32[16,64], index: 1, kind: output, shape index: {}]  }
   0x1   :  { %v180_v0 = vld [vmem:[%s289_s0 + $0x1c] sm:$0xf]  ;;  %v181_v1 = vld [vmem:[%s289_s0 + $0x18] sm:$0xf]  ;;  %v182_v2 = vld [vmem:[%s289_s0 + $0x14] sm:$0xf] }
   0x2   :  { %48 = vst [vmem:[#allocation0 + $0x38] sm:$0xf] %v180_v0  ;;  %53 = vst [vmem:[#allocation0 + $0x30] sm:$0xf] %v181_v1  ;;  %v183_v3 = vld [vmem:[%s289_s0 + $0x10] sm:$0xf] }
   0x3   :  { %58 = vst [vmem:[#allocation0 + $0x28] sm:$0xf] %v182_v2  ;;  %v184_v4 = vld [vmem:[%s289_s0 + $0xc] sm:$0xf]  ;;  %v185_v5 = vld [vmem:[%s289_s0 + $0x8] sm:$0xf] }
   0x4   :  { %63 = vst [vmem:[#allocation0 + $0x20] sm:$0xf] %v183_v3  ;;  %68 = vst [vmem:[#allocation0 + $0x18] sm:$0xf] %v184_v4  ;;  %v186_v6 = vld [vmem:[%s289_s0 + $0x4] sm:$0xf] }
   0x5   :  { %73 = vst [vmem:[#allocation0 + $0x10] sm:$0xf] %v185_v5  ;;  %v78_v7 = vld [vmem:[%s289_s0] sm:$0xf]  ;;  %77 = vst [vmem:[#allocation0 + $0x8] sm:$0xf] %v186_v6 }
   0x6   :  { %79 = vst [vmem:[#allocation0] sm:$0xf] %v78_v7  ;;  %v172_v8 = vld [vmem:[%s289_s0 + $0x3c] sm:$0xf]  ;;  %v173_v9 = vld [vmem:[%s289_s0 + $0x38] sm:$0xf] }
   0x7   :  { %8 = vst [vmem:[#allocation0 + $0x78] sm:$0xf] %v172_v8  ;;  %13 = vst [vmem:[#allocation0 + $0x70] sm:$0xf] %v173_v9  ;;  %v174_v10 = vld [vmem:[%s289_s0 + $0x34] sm:$0xf] }
   0x8   :  { %v175_v11 = vld [vmem:[%s289_s0 + $0x30] sm:$0xf]  ;;  %v176_v12 = vld [vmem:[%s289_s0 + $0x2c] sm:$0xf]  ;;  %18 = vst [vmem:[#allocation0 + $0x68] sm:$0xf] %v174_v10 }
   0x9   :  { %23 = vst [vmem:[#allocation0 + $0x60] sm:$0xf] %v175_v11  ;;  %28 = vst [vmem:[#allocation0 + $0x58] sm:$0xf] %v176_v12  ;;  %v177_v13 = vld [vmem:[%s289_s0 + $0x28] sm:$0xf] }
   0xa   :  { %v178_v14 = vld [vmem:[%s289_s0 + $0x24] sm:$0xf]  ;;  %v179_v15 = vld [vmem:[%s289_s0 + $0x20] sm:$0xf]  ;;  %33 = vst [vmem:[#allocation0 + $0x50] sm:$0xf] %v177_v13 }
   0xb   :  { %38 = vst [vmem:[#allocation0 + $0x48] sm:$0xf] %v178_v14  ;;  %43 = vst [vmem:[#allocation0 + $0x40] sm:$0xf] %v179_v15  ;;  %s194_s0 = smov 32   ;;  %vm145_vm4 = vcmask 261248  }
   0xc   :  { %v119_v16 = vld [vmem:[#allocation0 + $0x2] ss:$8 sm:$0xf0]   ;;  %v98_v17 = vld [vmem:[#allocation0 + $0x3] ss:$8 sm:$0xf0]  }
   0xd   :  { %v117_v18 = vld [vmem:[#allocation0 + $0x2] ss:$8 sm:$0xf]   ;;  %v96_v19 = vld [vmem:[#allocation0 + $0x3] ss:$8 sm:$0xf]  }
   0xe   :  { %v121_v20 = vsel %vm82_vm0, %v119_v16, %v117_v18  ;;  %v100_v21 = vsel %vm82_vm0, %v98_v17, %v96_v19  ;;  %v138_v24 = vld [vmem:[#allocation0 + $0x1] ss:$8 sm:$0xf]   ;;  %v80_v32 = vld [vmem:[#allocation0] ss:$8 sm:$0xf]  }
   0xf   :  { %122 = vrot.lane.b32.xlu1 %v121_v20, %s194_s0  ;;  %101 = vrot.lane.b32.xlu0 %v100_v21, %s195_s9  ;;  %v140_v25 = vld [vmem:[#allocation0 + $0x1] ss:$8 sm:$0xf0]   ;;  %v81_v33 = vld [vmem:[#allocation0] ss:$8 sm:$0xf0]  }
  0x10   :  { %v129_v22 = vld [vmem:[#allocation0 + $0x42] ss:$8 sm:$0xf0]   ;;  %v108_v23 = vld [vmem:[#allocation0 + $0x43] ss:$8 sm:$0xf0]   ;;  %v83_v34 = vsel %vm82_vm0, %v81_v33, %v80_v32  ;;  %v142_v38 = vsel %vm82_vm0, %v140_v25, %v138_v24 }
  0x11   :  { %v150_v31 = vld [vmem:[#allocation0 + $0x41] ss:$8 sm:$0xf0]   ;;  %v89_v36 = vld [vmem:[#allocation0 + $0x40] ss:$8 sm:$0xf0]  }
  0x12   :  { %v127_v26 = vld [vmem:[#allocation0 + $0x42] ss:$8 sm:$0xf]   ;;  %v106_v27 = vld [vmem:[#allocation0 + $0x43] ss:$8 sm:$0xf]  }
  0x13   :  { %v131_v28 = vsel %vm82_vm0, %v129_v22, %v127_v26  ;;  %v110_v29 = vsel %vm82_vm0, %v108_v23, %v106_v27  ;;  %v148_v30 = vld [vmem:[#allocation0 + $0x41] ss:$8 sm:$0xf]   ;;  %v87_v35 = vld [vmem:[#allocation0 + $0x40] ss:$8 sm:$0xf]  }
  0x14   :  { %132 = vrot.lane.b32.xlu1 %v131_v28, %s194_s0  ;;  %111 = vrot.lane.b32.xlu0 %v110_v29, %s195_s9  ;;  %v152_v37 = vsel %vm82_vm0, %v150_v31, %v148_v30  ;;  %85 = vst.msk [vmem:[%s290_s1] sm:$0xff] %vm84_vm1, %v83_v34   ;;  %v91_v39 = vsel %vm82_vm0, %v89_v36, %v87_v35 }
  0x15   :  { %187 = vst.msk [vmem:[%s290_s1 + $0x8] sm:$0xff] %vm84_vm1, %v91_v39  }
  0x18   :  { %153 = vrot.lane.b32.xlu1 %v152_v37, %s196_s14  ;;  %143 = vrot.lane.b32.xlu0 %v142_v38, %s196_s14 }
  0x81   :  { %v123_v40 = vpop.permute.xlu1 %122   ;;  %v102_v41 = vpop.permute.xlu0 %101  }
  0x82   :  { %104 = vst.msk [vmem:[%s290_s1] sm:$0xff] %vm103_vm2, %v102_v41  }
  0x83   :  { %125 = vst.msk [vmem:[%s290_s1] sm:$0xff] %vm124_vm3, %v123_v40  }
  0x86   :  { %v133_v42 = vpop.permute.xlu1 %132   ;;  %v112_v43 = vpop.permute.xlu0 %111  }
  0x87   :  { %188 = vst.msk [vmem:[%s290_s1 + $0x8] sm:$0xff] %vm103_vm2, %v112_v43  }
  0x88   :  { %189 = vst.msk [vmem:[%s290_s1 + $0x8] sm:$0xff] %vm124_vm3, %v133_v42  }
  0x8a   :  { %v154_v44 = vpop.permute.xlu1 %153   ;;  %v144_v45 = vpop.permute.xlu0 %143  }
  0x8b   :  { %190 = vst.msk [vmem:[%s290_s1 + $0x8] sm:$0xff] %vm145_vm4, %v154_v44   ;;  %146 = vst.msk [vmem:[%s290_s1] sm:$0xff] %vm145_vm4, %v144_v45  }

// kernel: generator_forward.3
= control target key start
LH: loop header
LB: loop body
LE: loop exit
PB: predicated region body
PF: predicated region fallthrough
CT: control target
= control target key end

     0   :  { %v491_v0 = vmov 0.0   ;;  %vm492_vm0 = vmmov 0   ;;  %v493_v2 = vmov 0.0|0.0   ;;  %vm139_vm1 = vcmask 1040384   ;;  %s635_s1 = inlined_call_operand.vmem [shape: bf16[128,128], index: 1, kind: input, shape index: {}]   ;;  %s636_s2 = inlined_call_operand.vmem [shape: f32[128,32], index: 2, kind: input, shape index: {}]   ;;  %s637_s0 = inlined_call_operand.vmem [shape: bf16[8,128], index: 0, kind: input, shape index: {}]   ;;  %s638_s3 = inlined_call_operand.vmem [shape: f32[32,128], index: 3, kind: input, shape index: {}]   ;;  %s639_s4 = inlined_call_operand.vmem [shape: f32[2,32], index: 4, kind: input, shape index: {}]   ;;  %s640_s5 = inlined_call_operand.vmem [shape: f32[8,128], index: 5, kind: output, shape index: {}]  }
   0x1   :  { %382 = vmatprep.subr.bf16.mxu0 %v491_v0  ;;  %v481_v1 = vld [vmem:[%s635_s1] sm:$0xff]   ;;  %398 = vmatprep.mubr.msk.bf16.mxu0 %vm492_vm0, %v491_v0  ;;  %v482_v3 = vld [vmem:[%s635_s1 + $0x8] sm:$0xff]   ;;  %v483_v4 = vld [vmem:[%s635_s1 + $0x10] sm:$0xff]   ;;  %vm252_vm2 = vcmask 261120  }
   0x2   :  { %448 = vmatprep.subr.bf16.mxu1 %v493_v2  ;;  %434 = vmatprep.mubr.msk.f32.mxu1 %vm492_vm0, %v491_v0  ;;  %v141_v5 = vld [vmem:[%s636_s2] sm:$0xff]  ;;  %v142_v6 = vld [vmem:[%s636_s2 + $0x8] sm:$0xff]  ;;  %v143_v8 = vld [vmem:[%s636_s2 + $0x10] sm:$0xff] }
   0x3   :  { %383 = vmatpush3.bf16.msra.mxu0 %v481_v1  ;;  %v449_v7 = vpack.c.bf16 %v142_v6, %v141_v5  ;;  %v144_v9 = vld [vmem:[%s636_s2 + $0x18] sm:$0xff]  ;;  %v145_v12 = vld [vmem:[%s636_s2 + $0x20] sm:$0xff]  ;;  %v146_v13 = vld [vmem:[%s636_s2 + $0x28] sm:$0xff] }
   0x4   :  { %384 = vmatprep.subr.bf16.mxu0 %v491_v0  ;;  %v484_v10 = vld [vmem:[%s635_s1 + $0x18] sm:$0xff]   ;;  %v452_v11 = vpack.c.bf16 %v144_v9, %v143_v8  ;;  %v485_v14 = vld [vmem:[%s635_s1 + $0x20] sm:$0xff]   ;;  %v455_v15 = vpack.c.bf16 %v146_v13, %v145_v12  ;;  %v147_v16 = vld [vmem:[%s636_s2 + $0x30] sm:$0xff]  ;;  %v326_v12 = vlaneseq }
   0x5   :  { %450 = vmatpush3.bf16.msra.mxu1 %v449_v7  ;;  %v148_v17 = vld [vmem:[%s636_s2 + $0x38] sm:$0xff]  ;;  %v486_v18 = vld [vmem:[%s635_s1 + $0x28] sm:$0xff]   ;;  %v487_v20 = vld [vmem:[%s635_s1 + $0x30] sm:$0xff]  }
   0x6   :  { %451 = vmatprep.subr.bf16.mxu1 %v493_v2  ;;  %v458_v19 = vpack.c.bf16 %v148_v17, %v147_v16  ;;  %v488_v21 = vld [vmem:[%s635_s1 + $0x38] sm:$0xff]   ;;  %v21_v22 = vld [vmem:[%s637_s0] sm:$0xf]  ;;  %v150_v24 = vld [vmem:[%s636_s2 + $0x48] sm:$0xff]  ;;  %v327_v13 = vshrl.u32 %v326_v12, 7 }
   0x7   :  { %385 = vmatpush3.bf16.msra.mxu0 %v482_v3  ;;  %v149_v23 = vld [vmem:[%s636_s2 + $0x40] sm:$0xff]  ;;  %v151_v26 = vld [vmem:[%s636_s2 + $0x50] sm:$0xff]  ;;  %v152_v27 = vld [vmem:[%s636_s2 + $0x58] sm:$0xff] }
   0x8   :  { %386 = vmatprep.subr.bf16.mxu0 %v491_v0  ;;  %v461_v25 = vpack.c.bf16 %v150_v24, %v149_v23  ;;  %v464_v28 = vpack.c.bf16 %v152_v27, %v151_v26  ;;  %v153_v29 = vld [vmem:[%s636_s2 + $0x60] sm:$0xff]  ;;  %v154_v30 = vld [vmem:[%s636_s2 + $0x68] sm:$0xff]  ;;  %v155_v32 = vld [vmem:[%s636_s2 + $0x70] sm:$0xff] }
   0x9   :  { %453 = vmatpush3.bf16.msra.mxu1 %v452_v11  ;;  %v467_v31 = vpack.c.bf16 %v154_v30, %v153_v29  ;;  %v156_v33 = vld [vmem:[%s636_s2 + $0x78] sm:$0xff]  ;;  %v248_v53 = vld [vmem:[%s638_s3] sm:$0xff]  ;;  %v249_v54 = vld [vmem:[%s638_s3 + $0x8] sm:$0xff] }
   0xa   :  { %454 = vmatprep.subr.bf16.mxu1 %v493_v2  ;;  %v470_v34 = vpack.c.bf16 %v156_v33, %v155_v32  ;;  %v473_v55 = vpack.c.bf16 %v249_v54, %v248_v53  ;;  %v250_v56 = vld [vmem:[%s638_s3 + $0x10] sm:$0xff]  ;;  %v251_v57 = vld [vmem:[%s638_s3 + $0x18] sm:$0xff]  ;;  %v241_v7 = vld [vmem:[%s639_s4 + $0x1] sm:$0x1] }
   0xb   :  { %387 = vmatpush3.bf16.msra.mxu0 %v483_v4  ;;  %v476_v58 = vpack.c.bf16 %v251_v57, %v250_v56  ;;  %v234_v4 = vld [vmem:[%s639_s4] sm:$0x1] }
   0xc   :  { %388 = vmatprep.subr.bf16.mxu0 %v491_v0 }
   0xd   :  { %456 = vmatpush3.bf16.msra.mxu1 %v455_v15  ;;  %v333_v15 = vsub.s32 1, %v327_v13 }
   0xe   :  { %457 = vmatprep.subr.bf16.mxu1 %v493_v2 }
   0xf   :  { %389 = vmatpush3.bf16.msra.mxu0 %v484_v10 }
  0x10   :  { %390 = vmatprep.subr.bf16.mxu0 %v491_v0 }
  0x11   :  { %459 = vmatpush3.bf16.msra.mxu1 %v458_v19 }
  0x12   :  { %460 = vmatprep.subr.bf16.mxu1 %v493_v2 }
  0x13   :  { %391 = vmatpush3.bf16.msra.mxu0 %v485_v14  ;;  %v328_v14 = vsub.s32 0, %v327_v13 }
  0x14   :  { %392 = vmatprep.subr.bf16.mxu0 %v491_v0 }
  0x15   :  { %462 = vmatpush3.bf16.msra.mxu1 %v461_v25 }
  0x16   :  { %463 = vmatprep.subr.bf16.mxu1 %v493_v2 }
  0x17   :  { %393 = vmatpush3.bf16.msra.mxu0 %v486_v18 }
  0x18   :  { %394 = vmatprep.subr.bf16.mxu0 %v491_v0 }
  0x19   :  { %465 = vmatpush3.bf16.msra.mxu1 %v464_v28 }
  0x1a   :  { %466 = vmatprep.subr.bf16.mxu1 %v493_v2 }
  0x1b   :  { %395 = vmatpush3.bf16.msra.mxu0 %v487_v20 }
  0x1c   :  { %396 = vmatprep.subr.bf16.mxu0 %v491_v0 }
  0x1d   :  { %468 = vmatpush3.bf16.msra.mxu1 %v467_v31 }
  0x1e   :  { %469 = vmatprep.subr.bf16.mxu1 %v493_v2 }
  0x1f   :  { %397 = vmatpush3.bf16.msra.mxu0 %v488_v21 }
  0x20   :  { %472 = vmatprep.subr.bf16.mxu0 %v493_v2 }
  0x21   :  { %471 = vmatpush3.bf16.msra.mxu1 %v470_v34 }
  0x22   :  { %399 = vmatmul.mubr.bf16.vlgmr.msra.gmra.mrb[0].mxu0 %v21_v22 }
  0x23   :  { %445 = vmatprep.mubr.msk.f32.mxu0 %vm492_vm0, %v491_v0  ;;  %474 = vmatpush3.bf16.msra.mxu0 %v473_v55 }
  0x24   :  { %475 = vmatprep.subr.bf16.mxu0 %v493_v2 }
  0x27   :  { %477 = vmatpush3.bf16.msra.mxu0 %v476_v58 }
  0xf5   :  { %v120_v35 = vpop.f32.mrb[0].mxu0 }
  0xf6   :  { %v126_v36 = vrot.slane %v120_v35, 4  ;;  %v132_v37 = vmul.f32 %v120_v35, %v120_v35  ;;  %v400_v38 = vpop.f32.mrb[1].mxu0 }
  0xf7   :  { %v123_v39 = vpop.f32.mrb[2].mxu0 }
  0xf8   :  { %v127_v40 = vadd.f32 %v126_v36, %v120_v35  ;;  %v133_v41 = vrot.slane %v132_v37, 4  ;;  %v401_v42 = vpop.f32.mrb[3].mxu0 }
  0xfa   :  { %v128_v43 = vrot.slane %v127_v40, 2  ;;  %v134_v44 = vadd.f32 %v133_v41, %v132_v37 }
  0xfc   :  { %v129_v45 = vadd.f32 %v128_v43, %v127_v40  ;;  %v135_v46 = vrot.slane %v134_v44, 2 }
  0xfe   :  { %v130_v47 = vrot.slane %v129_v45, 1  ;;  %v136_v48 = vadd.f32 %v135_v46, %v134_v44 }
 0x100   :  { %v137_v49 = vrot.slane %v136_v48, 1  ;;  %v131_v50 = vadd.f32 %v130_v47, %v129_v45 }
 0x102   :  { %v138_v51 = vadd.f32 %v137_v49, %v136_v48 }
 0x104   :  { %v140_v52 = vsel %vm139_vm1, %v131_v50, %v138_v51 }
 0x105   :  { %435 = vmatmul.mubr.f32.vlgmr.msra.gmra.mrb[0].mxu1 %v140_v52 }
 0x1d8   :  { %v223_v59 = vpop.f32.mrb[0].mxu1 }
 0x1d9   :  { %v227_v60 = vmul.f32 0.03125, %v223_v59  ;;  %v436_v61 = vpop.f32.mrb[1].mxu1 }
 0x1db   :  { %v228_v62 = vmul.f32 %v227_v60, %v227_v60 }
 0x1dd   :  { %v230_v63 = vrot.slane %v228_v62, 7 }
 0x1df   :  { %v232_v0 = vsub.f32 %v227_v60, %v230_v63 }
 0x1e1   :  { %v233_v1 = vmax.f32 %v232_v0, 0.0 }
 0x1e3   :  { %v235_v3 = vadd.f32 1e-05, %v233_v1 }
 0x1e5   :  { %489 = vrsqrt.f32 %v235_v3 }
 0x1ef   :  { %v490_v2 = vpop.eup %489 }
 0x1f0   :  { %v238_v5 = vrot.slane %v490_v2, 1 }
 0x1f2   :  { %v240_v6 = vmul.f32 %v238_v5, %v234_v4 }
 0x1f4   :  { %v242_v8 = vmul.f32 %v240_v6, %v227_v60 }
 0x1f6   :  { %v243_v9 = vsub.f32 %v241_v7, %v242_v8 }
 0x1f8   :  { %v245_v10 = vrot.slane %v243_v9, 7 }
 0x1fa   :  { %v247_v11 = vsel %vm139_vm1, %v240_v6, %v245_v10 }
 0x1fb   :  { %446 = vmatmul.mubr.msk.f32.vlgmr.msra.gmra.mrb[4].mxu0 %vm252_vm2, %v247_v11 }
 0x2ce   :  { %v322_v16 = vpop.f32.mrb[4].mxu0 }
 0x2cf   :  { %v329_v17 = vrot.slane %v322_v16, %v328_v14  ;;  %v447_v18 = vpop.f32.mrb[5].mxu0  ;;  %v334_v20 = vrot.slane %v322_v16, %v333_v15 }
 0x2d1   :  { %v330_v19 = vmul.f32 %v329_v17, %v120_v35 }
 0x2d3   :  { %v335_v21 = vadd.f32 %v334_v20, %v330_v19 }
 0x2d5   :  { %v336_v22 = vmax.f32 %v335_v21, 0.0 }
 0x2d7   :  { %337 = vst [vmem:[%s640_s5] sm:$0xff] %v336_v22 }

// kernel: generator_forward.4
= control target key start
LH: loop header
LB: loop body
LE: loop exit
PB: predicated region body
PF: predicated region fallthrough
CT: control target
= control target key end

     0   :  { %v592_v1 = vmov 0.0|0.0   ;;  %vm593_vm0 = vmmov 0   ;;  %v594_v36 = vmov 0.0   ;;  %vm183_vm1 = vcmask 1041408   ;;  %s797_s1 = inlined_call_operand.vmem [shape: bf16[128,128], index: 1, kind: input, shape index: {}]   ;;  %s798_s0 = inlined_call_operand.vmem [shape: bf16[50,128], index: 0, kind: input, shape index: {}]   ;;  %s799_s2 = inlined_call_operand.vmem [shape: f32[128,16], index: 2, kind: input, shape index: {}]   ;;  %s800_s3 = inlined_call_operand.vmem [shape: f32[16,128], index: 3, kind: input, shape index: {}]   ;;  %s801_s4 = inlined_call_operand.vmem [shape: f32[2,16], index: 4, kind: input, shape index: {}]   ;;  %s802_s5 = inlined_call_operand.vmem [shape: f32[50,128], index: 5, kind: output, shape index: {}]  }
   0x1   :  { %v578_v0 = vld [vmem:[%s797_s1] sm:$0xff]   ;;  %548 = vmatprep.subr.bf16.mxu1 %v592_v1  ;;  %v579_v2 = vld [vmem:[%s797_s1 + $0x8] sm:$0xff]   ;;  %v580_v3 = vld [vmem:[%s797_s1 + $0x10] sm:$0xff]   ;;  %538 = vmatprep.mubr.msk.f32.mxu1 %vm593_vm0, %v594_v36  ;;  %vm212_vm2 = vcmask 1040384   ;;  %vm323_vm3 = vcmask 130048  }
   0x2   :  { %482 = vmatprep.subr.bf16.mxu0 %v578_v0  ;;  %v581_v4 = vld [vmem:[%s797_s1 + $0x18] sm:$0xff]   ;;  %v586_v5 = vld [vmem:[%s798_s0] sm:$0xff]   ;;  %v583_v7 = vld [vmem:[%s797_s1 + $0x28] sm:$0xff]  }
   0x3   :  { %483 = vmatpush3.bf16.msra.mxu0 %v578_v0  ;;  %498 = vmatprep.mubr.bf16.mxu0 %v586_v5  ;;  %v582_v6 = vld [vmem:[%s797_s1 + $0x20] sm:$0xff]   ;;  %v584_v8 = vld [vmem:[%s797_s1 + $0x30] sm:$0xff]   ;;  %v585_v9 = vld [vmem:[%s797_s1 + $0x38] sm:$0xff]  }
   0x4   :  { %484 = vmatprep.subr.bf16.mxu0 %v579_v2  ;;  %v587_v10 = vld [vmem:[%s798_s0 + $0x8] sm:$0xff]   ;;  %v588_v11 = vld [vmem:[%s798_s0 + $0x10] sm:$0xff]   ;;  %v589_v12 = vld [vmem:[%s798_s0 + $0x18] ss:$0 sps:$4 sm:$0x11]  }
   0x5   :  { %v214_v13 = vld [vmem:[%s799_s2] sm:$0xff]  ;;  %v215_v14 = vld [vmem:[%s799_s2 + $0x8] sm:$0xff]  ;;  %v216_v16 = vld [vmem:[%s799_s2 + $0x10] sm:$0xff] }
   0x6   :  { %v549_v15 = vpack.c.bf16 %v215_v14, %v214_v13  ;;  %v217_v17 = vld [vmem:[%s799_s2 + $0x18] sm:$0xff]  ;;  %v218_v19 = vld [vmem:[%s799_s2 + $0x20] sm:$0xff]  ;;  %v219_v20 = vld [vmem:[%s799_s2 + $0x28] sm:$0xff] }
   0x7   :  { %485 = vmatpush3.bf16.msra.mxu0 %v579_v2  ;;  %v552_v18 = vpack.c.bf16 %v217_v17, %v216_v16  ;;  %v555_v21 = vpack.c.bf16 %v219_v20, %v218_v19  ;;  %v220_v22 = vld [vmem:[%s799_s2 + $0x30] sm:$0xff]  ;;  %v221_v23 = vld [vmem:[%s799_s2 + $0x38] sm:$0xff]  ;;  %v222_v25 = vld [vmem:[%s799_s2 + $0x40] sm:$0xff] }
   0x8   :  { %486 = vmatprep.subr.bf16.mxu0 %v580_v3  ;;  %550 = vmatpush3.bf16.msra.mxu1 %v549_v15  ;;  %v558_v24 = vpack.c.bf16 %v221_v23, %v220_v22  ;;  %v223_v26 = vld [vmem:[%s799_s2 + $0x48] sm:$0xff]  ;;  %v224_v28 = vld [vmem:[%s799_s2 + $0x50] sm:$0xff]  ;;  %v225_v29 = vld [vmem:[%s799_s2 + $0x58] sm:$0xff] }
   0x9   :  { %551 = vmatprep.subr.bf16.mxu1 %v592_v1  ;;  %v561_v27 = vpack.c.bf16 %v223_v26, %v222_v25  ;;  %v564_v30 = vpack.c.bf16 %v225_v29, %v224_v28  ;;  %v226_v31 = vld [vmem:[%s799_s2 + $0x60] sm:$0xff]  ;;  %v227_v32 = vld [vmem:[%s799_s2 + $0x68] sm:$0xff]  ;;  %v228_v34 = vld [vmem:[%s799_s2 + $0x70] sm:$0xff] }
   0xa   :  { %v567_v33 = vpack.c.bf16 %v227_v32, %v226_v31  ;;  %v229_v35 = vld [vmem:[%s799_s2 + $0x78] sm:$0xff]  ;;  %v321_v16 = vld [vmem:[%s800_s3] sm:$0xff]  ;;  %v322_v17 = vld [vmem:[%s800_s3 + $0x8] sm:$0xff] }
   0xb   :  { %487 = vmatpush3.bf16.msra.mxu0 %v580_v3  ;;  %v570_v37 = vpack.c.bf16 %v229_v35, %v228_v34  ;;  %v307_v28 = vld [vmem:[%s801_s4] sm:$0x1]  ;;  %v314_v31 = vld [vmem:[%s801_s4 + $0x1] sm:$0x1] }
   0xc   :  { %488 = vmatprep.subr.bf16.mxu0 %v581_v4  ;;  %553 = vmatpush3.bf16.msra.mxu1 %v552_v18  ;;  %v573_v18 = vpack.c.bf16 %v322_v17, %v321_v16 }
   0xd   :  { %554 = vmatprep.subr.bf16.mxu1 %v592_v1 }
   0xf   :  { %489 = vmatpush3.bf16.msra.mxu0 %v581_v4 }
  0x10   :  { %490 = vmatprep.subr.bf16.mxu0 %v582_v6  ;;  %556 = vmatpush3.bf16.msra.mxu1 %v555_v21 }
  0x11   :  { %557 = vmatprep.subr.bf16.mxu1 %v592_v1 }
  0x13   :  { %491 = vmatpush3.bf16.msra.mxu0 %v582_v6 }
  0x14   :  { %492 = vmatprep.subr.bf16.mxu0 %v583_v7  ;;  %559 = vmatpush3.bf16.msra.mxu1 %v558_v24 }
  0x15   :  { %560 = vmatprep.subr.bf16.mxu1 %v592_v1 }
  0x17   :  { %493 = vmatpush3.bf16.msra.mxu0 %v583_v7 }
  0x18   :  { %494 = vmatprep.subr.bf16.mxu0 %v584_v8  ;;  %562 = vmatpush3.bf16.msra.mxu1 %v561_v27 }
  0x19   :  { %563 = vmatprep.subr.bf16.mxu1 %v592_v1 }
  0x1b   :  { %495 = vmatpush3.bf16.msra.mxu0 %v584_v8 }
  0x1c   :  { %496 = vmatprep.subr.bf16.mxu0 %v585_v9  ;;  %565 = vmatpush3.bf16.msra.mxu1 %v564_v30 }
  0x1d   :  { %566 = vmatprep.subr.bf16.mxu1 %v592_v1 }
  0x1f   :  { %497 = vmatpush3.bf16.msra.mxu0 %v585_v9 }
  0x20   :  { %568 = vmatpush3.bf16.msra.mxu1 %v567_v33 }
  0x21   :  { %569 = vmatprep.subr.bf16.mxu1 %v592_v1 }
  0x22   :  { %499 = vmatmul.mubr.bf16.vlgmr.msra.gmra.mrb[0].mxu0 %v587_v10 }
  0x23   :  { %502 = vmatprep.mubr.bf16.mxu0 %v588_v11 }
  0x24   :  { %571 = vmatpush3.bf16.msra.mxu1 %v570_v37 }
  0x25   :  { %572 = vmatprep.subr.bf16.mxu1 %v592_v1 }
  0x2a   :  { %503 = vmatmul.mubr.bf16.gmra.mrb[4].mxu0 %v589_v12 }
  0xf5   :  { %v719_v38 = vpop.f32.mrb[0].mxu0 }
  0xf6   :  { %v721_v39 = vpop.f32.mrb[1].mxu0  ;;  %v194_v45 = vmul.f32 %v719_v38, %v719_v38 }
  0xf7   :  { %v723_v40 = vpop.f32.mrb[2].mxu0  ;;  %v192_v42 = vmul.f32 %v721_v39, %v721_v39 }
  0xf8   :  { %v725_v41 = vpop.f32.mrb[3].mxu0  ;;  %v195_v48 = vmul.f32 %v723_v40, %v723_v40 }
  0xf9   :  { %v178_v43 = vadd.f32 %v725_v41, %v721_v39  ;;  %v193_v44 = vmul.f32 %v725_v41, %v725_v41 }
  0xfb   :  { %v179_v46 = vadd.f32 %v719_v38, %v178_v43  ;;  %v199_v47 = vadd.f32 %v193_v44, %v192_v42 }
  0xfd   :  { %v200_v49 = vadd.f32 %v199_v47, %v194_v45  ;;  %v738_v50 = vpop.f32.mrb[4].mxu0  ;;  %v180_v51 = vadd.f32 %v723_v40, %v179_v46 }
  0xfe   :  { %v741_v52 = vpop.f32.mrb[5].mxu0  ;;  %v198_v57 = vmul.f32 %v738_v50, %v738_v50  ;;  %v184_v62 = vsel %vm183_vm1, %v738_v50, 0.0 }
  0xff   :  { %v181_v53 = vadd.f32 %v180_v51, %v741_v52  ;;  %v196_v54 = vmul.f32 %v741_v52, %v741_v52  ;;  %v201_v55 = vadd.f32 %v200_v49, %v195_v48  ;;  %v505_v56 = vpop.f32.mrb[6].mxu0 }
 0x100   :  { %v748_v58 = vpop.f32.mrb[7].mxu0  ;;  %v204_v1 = vsel %vm183_vm1, %v198_v57, 0.0 }
 0x101   :  { %v202_v59 = vadd.f32 %v201_v55, %v196_v54  ;;  %v182_v60 = vadd.f32 %v181_v53, %v748_v58  ;;  %v197_v61 = vmul.f32 %v748_v58, %v748_v58 }
 0x103   :  { %v185_v63 = vadd.f32 %v184_v62, %v182_v60  ;;  %v203_v0 = vadd.f32 %v202_v59, %v197_v61 }
 0x105   :  { %v186_v2 = vrot.slane %v185_v63, 4  ;;  %v205_v3 = vadd.f32 %v204_v1, %v203_v0 }
 0x107   :  { %v187_v4 = vadd.f32 %v186_v2, %v185_v63  ;;  %v206_v5 = vrot.slane %v205_v3, 4 }
 0x109   :  { %v188_v6 = vrot.slane %v187_v4, 2  ;;  %v207_v7 = vadd.f32 %v206_v5, %v205_v3 }
 0x10b   :  { %v189_v8 = vadd.f32 %v188_v6, %v187_v4  ;;  %v208_v9 = vrot.slane %v207_v7, 2 }
 0x10d   :  { %v190_v10 = vrot.slane %v189_v8, 1  ;;  %v209_v11 = vadd.f32 %v208_v9, %v207_v7 }
 0x10f   :  { %v210_v12 = vrot.slane %v209_v11, 1  ;;  %v191_v13 = vadd.f32 %v190_v10, %v189_v8 }
 0x111   :  { %v211_v14 = vadd.f32 %v210_v12, %v209_v11 }
 0x113   :  { %v213_v15 = vsel %vm212_vm2, %v191_v13, %v211_v14 }
 0x114   :  { %539 = vmatmul.mubr.f32.vlgmr.msra.gmra.mrb[0].mxu1 %v213_v15 }
 0x115   :  { %545 = vmatprep.mubr.msk.f32.mxu1 %vm593_vm0, %v594_v36  ;;  %574 = vmatpush3.bf16.msra.mxu1 %v573_v18  ;;  %v397_v36 = vlaneseq }
 0x117   :  { %v398_v37 = vshrl.u32 %v397_v36, 7 }
 0x119   :  { %v399_v42 = vsub.s32 0, %v398_v37  ;;  %v410_v43 = vsub.s32 1, %v398_v37 }
 0x1e7   :  { %v296_v19 = vpop.f32.mrb[0].mxu1 }
 0x1e8   :  { %v300_v20 = vmul.f32 0.005, %v296_v19  ;;  %v540_v21 = vpop.f32.mrb[1].mxu1 }
 0x1ea   :  { %v301_v22 = vmul.f32 %v300_v20, %v300_v20 }
 0x1ec   :  { %v303_v23 = vrot.slane %v301_v22, 7 }
 0x1ee   :  { %v305_v24 = vsub.f32 %v300_v20, %v303_v23 }
 0x1f0   :  { %v306_v25 = vmax.f32 %v305_v24, 0.0 }
 0x1f2   :  { %v308_v26 = vadd.f32 1e-05, %v306_v25 }
 0x1f4   :  { %590 = vrsqrt.f32 %v308_v26 }
 0x1fe   :  { %v591_v27 = vpop.eup %590 }
 0x1ff   :  { %v311_v29 = vrot.slane %v591_v27, 1 }
 0x201   :  { %v313_v30 = vmul.f32 %v311_v29, %v307_v28 }
 0x203   :  { %v315_v32 = vmul.f32 %v313_v30, %v300_v20 }
 0x205   :  { %v316_v33 = vsub.f32 %v314_v31, %v315_v32 }
 0x207   :  { %v318_v34 = vrot.slane %v316_v33, 7 }
 0x209   :  { %v320_v35 = vsel %vm212_vm2, %v313_v30, %v318_v34 }
 0x20a   :  { %546 = vmatmul.mubr.msk.f32.vlgmr.msra.gmra.mrb[2].mxu1 %vm323_vm3, %v320_v35 }
 0x2dd   :  { %v393_v44 = vpop.f32.mrb[2].mxu1 }
 0x2de   :  { %v400_v45 = vrot.slane %v393_v44, %v399_v42  ;;  %v547_v46 = vpop.f32.mrb[3].mxu1  ;;  %v411_v47 = vrot.slane %v393_v44, %v410_v43 }
 0x2e0   :  { %v401_v48 = vmul.f32 %v400_v45, %v721_v39  ;;  %v402_v49 = vmul.f32 %v400_v45, %v725_v41  ;;  %v403_v51 = vmul.f32 %v719_v38, %v400_v45  ;;  %v404_v53 = vmul.f32 %v723_v40, %v400_v45 }
 0x2e1   :  { %v405_v54 = vmul.f32 %v400_v45, %v741_v52  ;;  %v406_v55 = vmul.f32 %v400_v45, %v748_v58  ;;  %v407_v56 = vmul.f32 %v738_v50, %v400_v45 }
 0x2e2   :  { %v412_v57 = vadd.f32 %v411_v47, %v401_v48  ;;  %v413_v59 = vadd.f32 %v411_v47, %v402_v49  ;;  %v414_v60 = vadd.f32 %v411_v47, %v403_v51  ;;  %v415_v61 = vadd.f32 %v411_v47, %v404_v53 }
 0x2e3   :  { %v416_v62 = vadd.f32 %v411_v47, %v405_v54  ;;  %v417_v63 = vadd.f32 %v411_v47, %v406_v55  ;;  %v418_v0 = vadd.f32 %v411_v47, %v407_v56 }
 0x2e4   :  { %v419_v39 = vmax.f32 %v412_v57, 0.0  ;;  %v420_v1 = vmax.f32 %v413_v59, 0.0  ;;  %v421_v41 = vmax.f32 %v414_v60, 0.0  ;;  %v422_v2 = vmax.f32 %v415_v61, 0.0 }
 0x2e5   :  { %v423_v38 = vmax.f32 %v416_v62, 0.0  ;;  %v424_v3 = vmax.f32 %v417_v63, 0.0  ;;  %v425_v40 = vmax.f32 %v418_v0, 0.0 }
 0x2e6   :  { %426 = vst [vmem:[%s802_s5] sm:$0xff] %v419_v39  ;;  %427 = vst [vmem:[%s802_s5 + $0x8] sm:$0xff] %v420_v1 }
 0x2e7   :  { %428 = vst [vmem:[%s802_s5 + $0x10] sm:$0xff] %v421_v41  ;;  %429 = vst [vmem:[%s802_s5 + $0x18] sm:$0xff] %v422_v2 }
 0x2e8   :  { %430 = vst [vmem:[%s802_s5 + $0x20] sm:$0xff] %v423_v38  ;;  %431 = vst [vmem:[%s802_s5 + $0x28] sm:$0xff] %v424_v3 }
 0x2e9   :  { %432 = vst [vmem:[%s802_s5 + $0x30] sm:$0x3] %v425_v40 }

// kernel: generator_forward.5
= control target key start
LH: loop header
LB: loop body
LE: loop exit
PB: predicated region body
PF: predicated region fallthrough
CT: control target
= control target key end

     0   :  { %v1946_v0 = vmov 0   ;;  %s2590_s1 = inlined_call_operand.vmem [shape: bf16[512,128], index: 1, kind: input, shape index: {}]   ;;  %s2591_s0 = inlined_call_operand.vmem [shape: bf16[392,512], index: 0, kind: input, shape index: {}]   ;;  %s2592_s2 = inlined_call_operand.vmem [shape: f32[1,128], index: 2, kind: input, shape index: {}]   ;;  %s2593_s3 = inlined_call_operand.vmem [shape: f32[392,128], index: 3, kind: output, shape index: {}]  }
   0x1   :  { %870 = vmatprep.subr.bf16.mxu1 %v1946_v0  ;;  %1102 = vmatprep.subr.bf16.mxu0 %v1946_v0  ;;  %v1668_v1 = vld [vmem:[%s2590_s1] sm:$0xff]   ;;  %v1670_v3 = vld [vmem:[%s2590_s1 + $0x8] sm:$0xff]   ;;  %v1672_v5 = vld [vmem:[%s2590_s1 + $0x10] sm:$0xff]  }
   0x2   :  { %v1669_v2 = vld [vmem:[%s2590_s1 + $0x80] sm:$0xff]   ;;  %871 = vmatpush1.bf16.msra.mxu1 %v1668_v1  ;;  %v1671_v4 = vld [vmem:[%s2590_s1 + $0x88] sm:$0xff]   ;;  %v1673_v6 = vld [vmem:[%s2590_s1 + $0x90] sm:$0xff]  }
   0x3   :  { %1103 = vmatpush1.bf16.msra.mxu0 %v1669_v2  ;;  %872 = vmatprep.subr.bf16.mxu1 %v1946_v0  ;;  %v1674_v7 = vld [vmem:[%s2590_s1 + $0x18] sm:$0xff]   ;;  %v1676_v9 = vld [vmem:[%s2590_s1 + $0x20] sm:$0xff]   ;;  %v1678_v11 = vld [vmem:[%s2590_s1 + $0x28] sm:$0xff]  }
   0x4   :  { %1104 = vmatprep.subr.bf16.mxu0 %v1946_v0  ;;  %v1675_v8 = vld [vmem:[%s2590_s1 + $0x98] sm:$0xff]   ;;  %v1677_v10 = vld [vmem:[%s2590_s1 + $0xa0] sm:$0xff]   ;;  %v1679_v12 = vld [vmem:[%s2590_s1 + $0xa8] sm:$0xff]  }
   0x5   :  { %v1680_v13 = vld [vmem:[%s2590_s1 + $0x30] sm:$0xff]   ;;  %v1682_v15 = vld [vmem:[%s2590_s1 + $0x38] sm:$0xff]   ;;  %v1684_v17 = vld [vmem:[%s2590_s1 + $0x40] sm:$0xff]  }
   0x6   :  { %873 = vmatpush1.bf16.msra.mxu1 %v1670_v3  ;;  %v1681_v14 = vld [vmem:[%s2590_s1 + $0xb0] sm:$0xff]   ;;  %v1683_v16 = vld [vmem:[%s2590_s1 + $0xb8] sm:$0xff]   ;;  %v1685_v18 = vld [vmem:[%s2590_s1 + $0xc0] sm:$0xff]  }
   0x7   :  { %1105 = vmatpush1.bf16.msra.mxu0 %v1671_v4  ;;  %874 = vmatprep.subr.bf16.mxu1 %v1946_v0  ;;  %v1702_v19 = vld [vmem:[%s2591_s0 + $0x4] ss:$16 sps:$4 sm:$0xff]   ;;  %v1686_v20 = vld [vmem:[%s2590_s1 + $0x48] sm:$0xff]   ;;  %v1690_v25 = vld [vmem:[%s2590_s1 + $0x58] sm:$0xff]  }
   0x8   :  { %1106 = vmatprep.subr.bf16.mxu0 %v1946_v0  ;;  %v1705_v21 = vld [vmem:[%s2591_s0 + $0xc] ss:$16 sps:$4 sm:$0xff]   ;;  %902 = vmatprep.mubr.bf16.mxu1 %v1702_v19  ;;  %v1688_v23 = vld [vmem:[%s2590_s1 + $0x50] sm:$0xff]   ;;  %v1692_v27 = vld [vmem:[%s2590_s1 + $0x60] sm:$0xff]  }
   0x9   :  { %v1687_v22 = vld [vmem:[%s2590_s1 + $0xc8] sm:$0xff]   ;;  %1134 = vmatprep.mubr.bf16.mxu0 %v1705_v21  ;;  %v1689_v24 = vld [vmem:[%s2590_s1 + $0xd0] sm:$0xff]   ;;  %v1691_v26 = vld [vmem:[%s2590_s1 + $0xd8] sm:$0xff]  }
   0xa   :  { %875 = vmatpush1.bf16.msra.mxu1 %v1672_v5  ;;  %v1693_v28 = vld [vmem:[%s2590_s1 + $0xe0] sm:$0xff]   ;;  %v1694_v29 = vld [vmem:[%s2590_s1 + $0x68] sm:$0xff]   ;;  %v1696_v31 = vld [vmem:[%s2590_s1 + $0x70] sm:$0xff]  }
   0xb   :  { %1107 = vmatpush1.bf16.msra.mxu0 %v1673_v6  ;;  %876 = vmatprep.subr.bf16.mxu1 %v1946_v0  ;;  %v1695_v30 = vld [vmem:[%s2590_s1 + $0xe8] sm:$0xff]   ;;  %v1697_v32 = vld [vmem:[%s2590_s1 + $0xf0] sm:$0xff]   ;;  %v1698_v33 = vld [vmem:[%s2590_s1 + $0x78] sm:$0xff]  }
   0xc   :  { %1108 = vmatprep.subr.bf16.mxu0 %v1946_v0  ;;  %v1699_v34 = vld [vmem:[%s2590_s1 + $0xf8] sm:$0xff]   ;;  %v1700_v35 = vld [vmem:[%s2591_s0] ss:$16 sps:$4 sm:$0xff]   ;;  %v1706_v37 = vld [vmem:[%s2591_s0 + $0x24] ss:$16 sps:$4 sm:$0xff]  }
   0xd   :  { %v1703_v36 = vld [vmem:[%s2591_s0 + $0x8] ss:$16 sps:$4 sm:$0xff]   ;;  %v1708_v38 = vld [vmem:[%s2591_s0 + $0x2c] ss:$16 sps:$4 sm:$0xff]   ;;  %v1710_v39 = vld [vmem:[%s2591_s0 + $0x20] ss:$16 sps:$4 sm:$0xff]  }
   0xe   :  { %877 = vmatpush1.bf16.msra.mxu1 %v1674_v7  ;;  %v1711_v40 = vld [vmem:[%s2591_s0 + $0x28] ss:$16 sps:$4 sm:$0xff]   ;;  %v1712_v41 = vld [vmem:[%s2591_s0 + $0x44] ss:$16 sps:$4 sm:$0xff]   ;;  %v1714_v42 = vld [vmem:[%s2591_s0 + $0x4c] ss:$16 sps:$4 sm:$0xff]  }
   0xf   :  { %1109 = vmatpush1.bf16.msra.mxu0 %v1675_v8  ;;  %878 = vmatprep.subr.bf16.mxu1 %v1946_v0  ;;  %v1716_v43 = vld [vmem:[%s2591_s0 + $0x40] ss:$16 sps:$4 sm:$0xff]   ;;  %v1717_v44 = vld [vmem:[%s2591_s0 + $0x48] ss:$16 sps:$4 sm:$0xff]   ;;  %v1718_v45 = vld [vmem:[%s2591_s0 + $0x64] ss:$16 sps:$4 sm:$0xff]  }
  0x10   :  { %1110 = vmatprep.subr.bf16.mxu0 %v1946_v0  ;;  %v1720_v46 = vld [vmem:[%s2591_s0 + $0x6c] ss:$16 sps:$4 sm:$0xff]   ;;  %v1722_v47 = vld [vmem:[%s2591_s0 + $0x60] ss:$16 sps:$4 sm:$0xff]   ;;  %v1723_v48 = vld [vmem:[%s2591_s0 + $0x68] ss:$16 sps:$4 sm:$0xff]  }
  0x11   :  { %v1724_v49 = vld [vmem:[%s2591_s0 + $0x84] ss:$16 sps:$4 sm:$0xff]   ;;  %v1726_v50 = vld [vmem:[%s2591_s0 + $0x8c] ss:$16 sps:$4 sm:$0xff]   ;;  %v1728_v51 = vld [vmem:[%s2591_s0 + $0x80] ss:$16 sps:$4 sm:$0xff]  }
  0x12   :  { %879 = vmatpush1.bf16.msra.mxu1 %v1676_v9  ;;  %v1729_v52 = vld [vmem:[%s2591_s0 + $0x88] ss:$16 sps:$4 sm:$0xff]   ;;  %v1730_v53 = vld [vmem:[%s2591_s0 + $0xa4] ss:$16 sps:$4 sm:$0xff]   ;;  %v1732_v54 = vld [vmem:[%s2591_s0 + $0xac] ss:$16 sps:$4 sm:$0xff]  }
  0x13   :  { %1111 = vmatpush1.bf16.msra.mxu0 %v1677_v10  ;;  %880 = vmatprep.subr.bf16.mxu1 %v1946_v0  ;;  %v1734_v55 = vld [vmem:[%s2591_s0 + $0xa0] ss:$16 sps:$4 sm:$0xff]   ;;  %v1735_v56 = vld [vmem:[%s2591_s0 + $0xa8] ss:$16 sps:$4 sm:$0xff]   ;;  %v1736_v57 = vld [vmem:[%s2591_s0 + $0xc4] ss:$16 sps:$4 sm:$0xff]  }
  0x14   :  { %1112 = vmatprep.subr.bf16.mxu0 %v1946_v0  ;;  %v1738_v58 = vld [vmem:[%s2591_s0 + $0xcc] ss:$16 sps:$4 sm:$0xff]   ;;  %v1740_v59 = vld [vmem:[%s2591_s0 + $0xc0] ss:$16 sps:$4 sm:$0xff]   ;;  %v1741_v60 = vld [vmem:[%s2591_s0 + $0xc8] ss:$16 sps:$4 sm:$0xff]  }
  0x15   :  { %v1742_v61 = vld [vmem:[%s2591_s0 + $0xe4] ss:$16 sps:$4 sm:$0xff]   ;;  %v1744_v62 = vld [vmem:[%s2591_s0 + $0xec] ss:$16 sps:$4 sm:$0xff]   ;;  %v1746_v63 = vld [vmem:[%s2591_s0 + $0xe0] ss:$16 sps:$4 sm:$0xff]  }
  0x16   :  { %881 = vmatpush1.bf16.msra.mxu1 %v1678_v11  ;;  %v1748_v1 = vld [vmem:[%s2591_s0 + $0x104] ss:$16 sps:$4 sm:$0xff]   ;;  %v1750_v2 = vld [vmem:[%s2591_s0 + $0x10c] ss:$16 sps:$4 sm:$0xff]   ;;  %v1752_v3 = vld [vmem:[%s2591_s0 + $0x100] ss:$16 sps:$4 sm:$0xff]  }
  0x17   :  { %1113 = vmatpush1.bf16.msra.mxu0 %v1679_v12  ;;  %882 = vmatprep.subr.bf16.mxu1 %v1946_v0  ;;  %v1753_v4 = vld [vmem:[%s2591_s0 + $0x108] ss:$16 sps:$4 sm:$0xff]   ;;  %v1754_v5 = vld [vmem:[%s2591_s0 + $0x124] ss:$16 sps:$4 sm:$0xff]   ;;  %v1756_v6 = vld [vmem:[%s2591_s0 + $0x12c] ss:$16 sps:$4 sm:$0xff]  }
  0x18   :  { %1114 = vmatprep.subr.bf16.mxu0 %v1946_v0  ;;  %v1758_v7 = vld [vmem:[%s2591_s0 + $0x120] ss:$16 sps:$4 sm:$0xff]   ;;  %v1759_v8 = vld [vmem:[%s2591_s0 + $0x128] ss:$16 sps:$4 sm:$0xff]   ;;  %v1760_v9 = vld [vmem:[%s2591_s0 + $0x144] ss:$16 sps:$4 sm:$0xff]  }
  0x19   :  { %v1762_v10 = vld [vmem:[%s2591_s0 + $0x14c] ss:$16 sps:$4 sm:$0xff]   ;;  %v1764_v11 = vld [vmem:[%s2591_s0 + $0x140] ss:$16 sps:$4 sm:$0xff]   ;;  %v1765_v12 = vld [vmem:[%s2591_s0 + $0x148] ss:$16 sps:$4 sm:$0xff]  }
  0x1a   :  { %883 = vmatpush1.bf16.msra.mxu1 %v1680_v13  ;;  %v1766_v13 = vld [vmem:[%s2591_s0 + $0x164] ss:$16 sps:$4 sm:$0xff]   ;;  %v1776_v19 = vld [vmem:[%s2591_s0 + $0x180] ss:$16 sps:$4 sm:$0xff]  }
  0x1b   :  { %1115 = vmatpush1.bf16.msra.mxu0 %v1681_v14  ;;  %884 = vmatprep.subr.bf16.mxu1 %v1946_v0  ;;  %v1768_v14 = vld [vmem:[%s2591_s0 + $0x16c] ss:$16 sps:$4 sm:$0xff]   ;;  %v1778_v21 = vld [vmem:[%s2591_s0 + $0x1a4] ss:$16 sps:$4 sm:$0xff]  }
  0x1c   :  { %1116 = vmatprep.subr.bf16.mxu0 %v1946_v0 }
  0x1e   :  { %885 = vmatpush1.bf16.msra.mxu1 %v1682_v15  ;;  %v1770_v15 = vld [vmem:[%s2591_s0 + $0x160] ss:$16 sps:$4 sm:$0xff]  }
  0x1f   :  { %1117 = vmatpush1.bf16.msra.mxu0 %v1683_v16  ;;  %886 = vmatprep.subr.bf16.mxu1 %v1946_v0  ;;  %v1771_v16 = vld [vmem:[%s2591_s0 + $0x168] ss:$16 sps:$4 sm:$0xff]  }
  0x20   :  { %1118 = vmatprep.subr.bf16.mxu0 %v1946_v0 }
  0x22   :  { %887 = vmatpush1.bf16.msra.mxu1 %v1684_v17  ;;  %v1772_v17 = vld [vmem:[%s2591_s0 + $0x184] ss:$16 sps:$4 sm:$0xff]  }
  0x23   :  { %1119 = vmatpush1.bf16.msra.mxu0 %v1685_v18  ;;  %888 = vmatprep.subr.bf16.mxu1 %v1946_v0  ;;  %v1774_v18 = vld [vmem:[%s2591_s0 + $0x18c] ss:$16 sps:$4 sm:$0xff]  }
  0x24   :  { %1120 = vmatprep.subr.bf16.mxu0 %v1946_v0 }
  0x26   :  { %889 = vmatpush1.bf16.msra.mxu1 %v1686_v20  ;;  %v1777_v20 = vld [vmem:[%s2591_s0 + $0x188] ss:$16 sps:$4 sm:$0xff]  }
  0x27   :  { %1121 = vmatpush1.bf16.msra.mxu0 %v1687_v22  ;;  %890 = vmatprep.subr.bf16.mxu1 %v1946_v0  ;;  %v1780_v22 = vld [vmem:[%s2591_s0 + $0x1ac] ss:$16 sps:$4 sm:$0xff]  }
  0x28   :  { %1122 = vmatprep.subr.bf16.mxu0 %v1946_v0 }
  0x2a   :  { %891 = vmatpush1.bf16.msra.mxu1 %v1688_v23  ;;  %v1782_v23 = vld [vmem:[%s2591_s0 + $0x1a0] ss:$16 sps:$4 sm:$0xff]  }
  0x2b   :  { %1123 = vmatpush1.bf16.msra.mxu0 %v1689_v24  ;;  %892 = vmatprep.subr.bf16.mxu1 %v1946_v0  ;;  %v1783_v24 = vld [vmem:[%s2591_s0 + $0x1a8] ss:$16 sps:$4 sm:$0xff]  }
  0x2c   :  { %1124 = vmatprep.subr.bf16.mxu0 %v1946_v0 }
  0x2e   :  { %893 = vmatpush1.bf16.msra.mxu1 %v1690_v25  ;;  %v1784_v25 = vld [vmem:[%s2591_s0 + $0x1c4] ss:$16 sps:$4 sm:$0xff]  }
  0x2f   :  { %1125 = vmatpush1.bf16.msra.mxu0 %v1691_v26  ;;  %894 = vmatprep.subr.bf16.mxu1 %v1946_v0  ;;  %v1786_v26 = vld [vmem:[%s2591_s0 + $0x1cc] ss:$16 sps:$4 sm:$0xff]  }
  0x30   :  { %1126 = vmatprep.subr.bf16.mxu0 %v1946_v0 }
  0x32   :  { %895 = vmatpush1.bf16.msra.mxu1 %v1692_v27  ;;  %v1788_v27 = vld [vmem:[%s2591_s0 + $0x1c0] ss:$16 sps:$4 sm:$0xff]  }
  0x33   :  { %1127 = vmatpush1.bf16.msra.mxu0 %v1693_v28  ;;  %896 = vmatprep.subr.bf16.mxu1 %v1946_v0  ;;  %v1789_v28 = vld [vmem:[%s2591_s0 + $0x1c8] ss:$16 sps:$4 sm:$0xff]  }
  0x34   :  { %1128 = vmatprep.subr.bf16.mxu0 %v1946_v0 }
  0x36   :  { %897 = vmatpush1.bf16.msra.mxu1 %v1694_v29  ;;  %v1790_v29 = vld [vmem:[%s2591_s0 + $0x1e4] ss:$16 sps:$4 sm:$0xff]  }
  0x37   :  { %1129 = vmatpush1.bf16.msra.mxu0 %v1695_v30  ;;  %898 = vmatprep.subr.bf16.mxu1 %v1946_v0  ;;  %v1792_v30 = vld [vmem:[%s2591_s0 + $0x1ec] ss:$16 sps:$4 sm:$0xff]  }
  0x38   :  { %1130 = vmatprep.subr.bf16.mxu0 %v1946_v0 }
  0x3a   :  { %899 = vmatpush1.bf16.msra.mxu1 %v1696_v31  ;;  %v1794_v31 = vld [vmem:[%s2591_s0 + $0x1e0] ss:$16 sps:$4 sm:$0xff]  }
  0x3b   :  { %1131 = vmatpush1.bf16.msra.mxu0 %v1697_v32  ;;  %900 = vmatprep.subr.bf16.mxu1 %v1946_v0  ;;  %v1795_v32 = vld [vmem:[%s2591_s0 + $0x1e8] ss:$16 sps:$4 sm:$0xff]  }
  0x3c   :  { %1132 = vmatprep.subr.bf16.mxu0 %v1946_v0  ;;  %v1747_v0 = vld [vmem:[%s2591_s0 + $0xe8] ss:$16 sps:$4 sm:$0xff]  }
  0x3e   :  { %901 = vmatpush1.bf16.msra.mxu1 %v1698_v33  ;;  %v1796_v33 = vld [vmem:[%s2591_s0 + $0x204] ss:$16 sps:$4 sm:$0xff]  }
  0x3f   :  { %1133 = vmatpush1.bf16.msra.mxu0 %v1699_v34  ;;  %v1798_v34 = vld [vmem:[%s2591_s0 + $0x20c] ss:$16 sps:$4 sm:$0xff]  }
  0x41   :  { %903 = vmatmul.mubr.bf16.vlgmr.msra.gmra.mrb[0].mxu1 %v1700_v35  ;;  %v1800_v35 = vld [vmem:[%s2591_s0 + $0x200] ss:$16 sps:$4 sm:$0xff]  }
  0x42   :  { %1135 = vmatmul.mubr.bf16.vlgmr.msra.gmra.mrb[0].mxu0 %v1703_v36  ;;  %910 = vmatprep.mubr.bf16.mxu1 %v1706_v37  ;;  %v1801_v36 = vld [vmem:[%s2591_s0 + $0x208] ss:$16 sps:$4 sm:$0xff]   ;;  %v1802_v37 = vld [vmem:[%s2591_s0 + $0x224] ss:$16 sps:$4 sm:$0xff]  }
  0x43   :  { %1142 = vmatprep.mubr.bf16.mxu0 %v1708_v38  ;;  %v1804_v38 = vld [vmem:[%s2591_s0 + $0x22c] ss:$16 sps:$4 sm:$0xff]  }
  0x49   :  { %911 = vmatmul.mubr.bf16.gmra.mrb[4].mxu1 %v1710_v39  ;;  %v1806_v39 = vld [vmem:[%s2591_s0 + $0x220] ss:$16 sps:$4 sm:$0xff]  }
  0x4a   :  { %1143 = vmatmul.mubr.bf16.gmra.mrb[4].mxu0 %v1711_v40  ;;  %918 = vmatprep.mubr.bf16.mxu1 %v1712_v41  ;;  %v1807_v40 = vld [vmem:[%s2591_s0 + $0x228] ss:$16 sps:$4 sm:$0xff]   ;;  %v1808_v41 = vld [vmem:[%s2591_s0 + $0x244] ss:$16 sps:$4 sm:$0xff]  }
  0x4b   :  { %1150 = vmatprep.mubr.bf16.mxu0 %v1714_v42  ;;  %v1810_v42 = vld [vmem:[%s2591_s0 + $0x24c] ss:$16 sps:$4 sm:$0xff]  }
  0x51   :  { %919 = vmatmul.mubr.bf16.gmra.mrb[8].mxu1 %v1716_v43  ;;  %v1812_v43 = vld [vmem:[%s2591_s0 + $0x240] ss:$16 sps:$4 sm:$0xff]  }
  0x52   :  { %1151 = vmatmul.mubr.bf16.gmra.mrb[8].mxu0 %v1717_v44  ;;  %926 = vmatprep.mubr.bf16.mxu1 %v1718_v45  ;;  %v1813_v44 = vld [vmem:[%s2591_s0 + $0x248] ss:$16 sps:$4 sm:$0xff]   ;;  %v1814_v45 = vld [vmem:[%s2591_s0 + $0x264] ss:$16 sps:$4 sm:$0xff]  }
  0x53   :  { %1158 = vmatprep.mubr.bf16.mxu0 %v1720_v46  ;;  %v1816_v46 = vld [vmem:[%s2591_s0 + $0x26c] ss:$16 sps:$4 sm:$0xff]  }
  0x59   :  { %927 = vmatmul.mubr.bf16.gmra.mrb[12].mxu1 %v1722_v47  ;;  %v1818_v47 = vld [vmem:[%s2591_s0 + $0x260] ss:$16 sps:$4 sm:$0xff]  }
  0x5a   :  { %1159 = vmatmul.mubr.bf16.gmra.mrb[12].mxu0 %v1723_v48  ;;  %934 = vmatprep.mubr.bf16.mxu1 %v1724_v49  ;;  %v1819_v48 = vld [vmem:[%s2591_s0 + $0x268] ss:$16 sps:$4 sm:$0xff]   ;;  %v1820_v49 = vld [vmem:[%s2591_s0 + $0x284] ss:$16 sps:$4 sm:$0xff]  }
  0x5b   :  { %1166 = vmatprep.mubr.bf16.mxu0 %v1726_v50  ;;  %v1822_v50 = vld [vmem:[%s2591_s0 + $0x28c] ss:$16 sps:$4 sm:$0xff]  }
  0x61   :  { %935 = vmatmul.mubr.bf16.gmra.mrb[16].mxu1 %v1728_v51  ;;  %v1824_v51 = vld [vmem:[%s2591_s0 + $0x280] ss:$16 sps:$4 sm:$0xff]  }
  0x62   :  { %1167 = vmatmul.mubr.bf16.gmra.mrb[16].mxu0 %v1729_v52  ;;  %942 = vmatprep.mubr.bf16.mxu1 %v1730_v53  ;;  %v1825_v52 = vld [vmem:[%s2591_s0 + $0x288] ss:$16 sps:$4 sm:$0xff]   ;;  %v1826_v53 = vld [vmem:[%s2591_s0 + $0x2a4] ss:$16 sps:$4 sm:$0xff]  }
  0x63   :  { %1174 = vmatprep.mubr.bf16.mxu0 %v1732_v54  ;;  %v1828_v54 = vld [vmem:[%s2591_s0 + $0x2ac] ss:$16 sps:$4 sm:$0xff]  }
  0x69   :  { %943 = vmatmul.mubr.bf16.gmra.mrb[20].mxu1 %v1734_v55  ;;  %v1830_v55 = vld [vmem:[%s2591_s0 + $0x2a0] ss:$16 sps:$4 sm:$0xff]  }
  0x6a   :  { %1175 = vmatmul.mubr.bf16.gmra.mrb[20].mxu0 %v1735_v56  ;;  %950 = vmatprep.mubr.bf16.mxu1 %v1736_v57  ;;  %v1831_v56 = vld [vmem:[%s2591_s0 + $0x2a8] ss:$16 sps:$4 sm:$0xff]   ;;  %v1832_v57 = vld [vmem:[%s2591_s0 + $0x2c4] ss:$16 sps:$4 sm:$0xff]  }
  0x6b   :  { %1182 = vmatprep.mubr.bf16.mxu0 %v1738_v58  ;;  %v1834_v58 = vld [vmem:[%s2591_s0 + $0x2cc] ss:$16 sps:$4 sm:$0xff]  }
  0x71   :  { %951 = vmatmul.mubr.bf16.gmra.mrb[24].mxu1 %v1740_v59  ;;  %v1836_v59 = vld [vmem:[%s2591_s0 + $0x2c0] ss:$16 sps:$4 sm:$0xff]  }
  0x72   :  { %1183 = vmatmul.mubr.bf16.gmra.mrb[24].mxu0 %v1741_v60  ;;  %958 = vmatprep.mubr.bf16.mxu1 %v1742_v61  ;;  %v1837_v60 = vld [vmem:[%s2591_s0 + $0x2c8] ss:$16 sps:$4 sm:$0xff]   ;;  %v1838_v61 = vld [vmem:[%s2591_s0 + $0x2e4] ss:$16 sps:$4 sm:$0xff]  }
  0x73   :  { %1190 = vmatprep.mubr.bf16.mxu0 %v1744_v62  ;;  %v1840_v62 = vld [vmem:[%s2591_s0 + $0x2ec] ss:$16 sps:$4 sm:$0xff]  }
  0x79   :  { %959 = vmatmul.mubr.bf16.gmra.mrb[28].mxu1 %v1746_v63  ;;  %v111_v63 = vld [vmem:[%s2591_s0 + $0x300] sm:$0xff] }
  0x7a   :  { %1191 = vmatmul.mubr.bf16.gmra.mrb[28].mxu0 %v1747_v0  ;;  %966 = vmatprep.mubr.bf16.mxu1 %v1748_v1  ;;  %v112_v0 = vld [vmem:[%s2591_s0 + $0x308] sm:$0xff]  ;;  %v1842_v1 = vld [vmem:[%s2591_s0 + $0x2e0] ss:$16 sps:$4 sm:$0xff]  }
  0x7b   :  { %1198 = vmatprep.mubr.bf16.mxu0 %v1750_v2  ;;  %v1843_v2 = vld [vmem:[%s2591_s0 + $0x2e8] ss:$16 sps:$4 sm:$0xff]  }
  0x81   :  { %967 = vmatmul.mubr.bf16.gmra.mrb[32].mxu1 %v1752_v3  ;;  %v1534_v3 = vcombine.high %v111_v63, %v111_v63 }
  0x82   :  { %1199 = vmatmul.mubr.bf16.gmra.mrb[32].mxu0 %v1753_v4  ;;  %974 = vmatprep.mubr.bf16.mxu1 %v1754_v5  ;;  %v1536_v4 = vcombine.high %v112_v0, %v112_v0  ;;  %v1533_v5 = vcombine.low %v111_v63, %v111_v63 }
  0x83   :  { %1206 = vmatprep.mubr.bf16.mxu0 %v1756_v6  ;;  %v1535_v6 = vcombine.low %v112_v0, %v112_v0 }
  0x89   :  { %975 = vmatmul.mubr.bf16.gmra.mrb[36].mxu1 %v1758_v7  ;;  %v2392_v7 = vld [vmem:[%s2592_s2] ss:$0 sm:$0xff] }
  0x8a   :  { %1207 = vmatmul.mubr.bf16.gmra.mrb[36].mxu0 %v1759_v8  ;;  %982 = vmatprep.mubr.bf16.mxu1 %v1760_v9 }
  0x8b   :  { %1214 = vmatprep.mubr.bf16.mxu0 %v1762_v10 }
  0x91   :  { %983 = vmatmul.mubr.bf16.gmra.mrb[40].mxu1 %v1764_v11 }
  0x92   :  { %1215 = vmatmul.mubr.bf16.gmra.mrb[40].mxu0 %v1765_v12  ;;  %990 = vmatprep.mubr.bf16.mxu1 %v1766_v13 }
  0x93   :  { %1222 = vmatprep.mubr.bf16.mxu0 %v1768_v14 }
  0x99   :  { %991 = vmatmul.mubr.bf16.gmra.mrb[44].mxu1 %v1770_v15 }
  0x9a   :  { %1223 = vmatmul.mubr.bf16.gmra.mrb[44].mxu0 %v1771_v16  ;;  %998 = vmatprep.mubr.bf16.mxu1 %v1772_v17 }
  0x9b   :  { %1230 = vmatprep.mubr.bf16.mxu0 %v1774_v18 }
  0xa1   :  { %999 = vmatmul.mubr.bf16.gmra.mrb[48].mxu1 %v1776_v19 }
  0xa2   :  { %1231 = vmatmul.mubr.bf16.gmra.mrb[48].mxu0 %v1777_v20  ;;  %1006 = vmatprep.mubr.bf16.mxu1 %v1778_v21 }
  0xa3   :  { %1238 = vmatprep.mubr.bf16.mxu0 %v1780_v22 }
  0xa9   :  { %1007 = vmatmul.mubr.bf16.gmra.mrb[52].mxu1 %v1782_v23 }
  0xaa   :  { %1239 = vmatmul.mubr.bf16.gmra.mrb[52].mxu0 %v1783_v24  ;;  %1014 = vmatprep.mubr.bf16.mxu1 %v1784_v25 }
  0xab   :  { %1246 = vmatprep.mubr.bf16.mxu0 %v1786_v26 }
  0xb1   :  { %1015 = vmatmul.mubr.bf16.gmra.mrb[56].mxu1 %v1788_v27 }
  0xb2   :  { %1247 = vmatmul.mubr.bf16.gmra.mrb[56].mxu0 %v1789_v28  ;;  %1022 = vmatprep.mubr.bf16.mxu1 %v1790_v29 }
  0xb3   :  { %1254 = vmatprep.mubr.bf16.mxu0 %v1792_v30 }
  0xb9   :  { %1023 = vmatmul.mubr.bf16.gmra.mrb[60].mxu1 %v1794_v31 }
  0xba   :  { %1255 = vmatmul.mubr.bf16.gmra.mrb[60].mxu0 %v1795_v32  ;;  %1030 = vmatprep.mubr.bf16.mxu1 %v1796_v33 }
  0xbb   :  { %1262 = vmatprep.mubr.bf16.mxu0 %v1798_v34 }
  0xc1   :  { %1031 = vmatmul.mubr.bf16.gmra.mrb[64].mxu1 %v1800_v35 }
  0xc2   :  { %1263 = vmatmul.mubr.bf16.gmra.mrb[64].mxu0 %v1801_v36  ;;  %1038 = vmatprep.mubr.bf16.mxu1 %v1802_v37 }
  0xc3   :  { %1270 = vmatprep.mubr.bf16.mxu0 %v1804_v38 }
  0xc9   :  { %1039 = vmatmul.mubr.bf16.gmra.mrb[68].mxu1 %v1806_v39 }
  0xca   :  { %1271 = vmatmul.mubr.bf16.gmra.mrb[68].mxu0 %v1807_v40  ;;  %1046 = vmatprep.mubr.bf16.mxu1 %v1808_v41 }
  0xcb   :  { %1278 = vmatprep.mubr.bf16.mxu0 %v1810_v42 }
  0xd1   :  { %1047 = vmatmul.mubr.bf16.gmra.mrb[72].mxu1 %v1812_v43 }
  0xd2   :  { %1279 = vmatmul.mubr.bf16.gmra.mrb[72].mxu0 %v1813_v44  ;;  %1054 = vmatprep.mubr.bf16.mxu1 %v1814_v45 }
  0xd3   :  { %1286 = vmatprep.mubr.bf16.mxu0 %v1816_v46 }
  0xd9   :  { %1055 = vmatmul.mubr.bf16.gmra.mrb[76].mxu1 %v1818_v47 }
  0xda   :  { %1287 = vmatmul.mubr.bf16.gmra.mrb[76].mxu0 %v1819_v48  ;;  %1062 = vmatprep.mubr.bf16.mxu1 %v1820_v49 }
  0xdb   :  { %1294 = vmatprep.mubr.bf16.mxu0 %v1822_v50 }
  0xe1   :  { %1063 = vmatmul.mubr.bf16.gmra.mrb[80].mxu1 %v1824_v51 }
  0xe2   :  { %1295 = vmatmul.mubr.bf16.gmra.mrb[80].mxu0 %v1825_v52  ;;  %1070 = vmatprep.mubr.bf16.mxu1 %v1826_v53 }
  0xe3   :  { %1302 = vmatprep.mubr.bf16.mxu0 %v1828_v54 }
  0xe9   :  { %1071 = vmatmul.mubr.bf16.gmra.mrb[84].mxu1 %v1830_v55 }
  0xea   :  { %1303 = vmatmul.mubr.bf16.gmra.mrb[84].mxu0 %v1831_v56  ;;  %1078 = vmatprep.mubr.bf16.mxu1 %v1832_v57 }
  0xeb   :  { %1310 = vmatprep.mubr.bf16.mxu0 %v1834_v58 }
  0xf1   :  { %1079 = vmatmul.mubr.bf16.gmra.mrb[88].mxu1 %v1836_v59 }
  0xf2   :  { %1311 = vmatmul.mubr.bf16.gmra.mrb[88].mxu0 %v1837_v60  ;;  %1086 = vmatprep.mubr.bf16.mxu1 %v1838_v61 }
  0xf3   :  { %1318 = vmatprep.mubr.bf16.mxu0 %v1840_v62 }
  0xf9   :  { %1087 = vmatmul.mubr.bf16.gmra.mrb[92].mxu1 %v1842_v1 }
  0xfa   :  { %1319 = vmatmul.mubr.bf16.gmra.mrb[92].mxu0 %v1843_v2  ;;  %1094 = vmatprep.mubr.bf16.mxu1 %v1534_v3 }
  0xfb   :  { %1326 = vmatprep.mubr.bf16.mxu0 %v1536_v4 }
 0x101   :  { %1095 = vmatmul.mubr.bf16.gmra.mrb[96].mxu1 %v1533_v5 }
 0x102   :  { %1327 = vmatmul.mubr.bf16.gmra.mrb[96].mxu0 %v1535_v6 }
 0x114   :  { %v904_v8 = vpop.f32.mrb[0].mxu1 }
 0x115   :  { %v905_v9 = vadd.f32 %v2392_v7, %v904_v8  ;;  %v1136_v10 = vpop.f32.mrb[0].mxu0  ;;  %v906_v11 = vpop.f32.mrb[1].mxu1 }
 0x116   :  { %v1138_v12 = vpop.f32.mrb[1].mxu0  ;;  %v907_v13 = vpop.f32.mrb[2].mxu1 }
 0x117   :  { %v1137_v14 = vadd.f32 %v1136_v10, %v905_v9  ;;  %v908_v15 = vadd.f32 %v2392_v7, %v907_v13  ;;  %v1139_v16 = vpop.f32.mrb[2].mxu0  ;;  %v909_v17 = vpop.f32.mrb[3].mxu1 }
 0x118   :  { %v1141_v18 = vpop.f32.mrb[3].mxu0 }
 0x119   :  { %1848 = vtanh.f32 %v1137_v14  ;;  %v1140_v19 = vadd.f32 %v1139_v16, %v908_v15 }
 0x11b   :  { %1850 = vtanh.f32 %v1140_v19 }
 0x11c   :  { %v912_v20 = vpop.f32.mrb[4].mxu1 }
 0x11d   :  { %v913_v21 = vadd.f32 %v2392_v7, %v912_v20  ;;  %v1144_v22 = vpop.f32.mrb[4].mxu0  ;;  %v914_v23 = vpop.f32.mrb[5].mxu1 }
 0x11e   :  { %v1146_v24 = vpop.f32.mrb[5].mxu0  ;;  %v915_v25 = vpop.f32.mrb[6].mxu1 }
 0x11f   :  { %v1145_v26 = vadd.f32 %v1144_v22, %v913_v21  ;;  %v916_v27 = vadd.f32 %v2392_v7, %v915_v25  ;;  %v1147_v28 = vpop.f32.mrb[6].mxu0  ;;  %v917_v29 = vpop.f32.mrb[7].mxu1 }
 0x120   :  { %v1149_v30 = vpop.f32.mrb[7].mxu0 }
 0x121   :  { %1852 = vtanh.f32 %v1145_v26  ;;  %v1148_v31 = vadd.f32 %v1147_v28, %v916_v27 }
 0x123   :  { %v1849_v32 = vpop.eup %1848  ;;  %1854 = vtanh.f32 %v1148_v31 }
 0x124   :  { %1383 = vst [vmem:[%s2593_s3] sm:$0xff] %v1849_v32  ;;  %v920_v33 = vpop.f32.mrb[8].mxu1 }
 0x125   :  { %v1851_v34 = vpop.eup %1850  ;;  %v921_v35 = vadd.f32 %v2392_v7, %v920_v33  ;;  %v1152_v36 = vpop.f32.mrb[8].mxu0 }
 0x126   :  { %v922_v37 = vpop.f32.mrb[9].mxu1  ;;  %1384 = vst [vmem:[%s2593_s3 + $0x8] sm:$0xff] %v1851_v34  ;;  %v1154_v38 = vpop.f32.mrb[9].mxu0 }
 0x127   :  { %v923_v39 = vpop.f32.mrb[10].mxu1  ;;  %v1153_v40 = vadd.f32 %v1152_v36, %v921_v35  ;;  %v1155_v42 = vpop.f32.mrb[10].mxu0 }
 0x128   :  { %v924_v41 = vadd.f32 %v2392_v7, %v923_v39  ;;  %v925_v43 = vpop.f32.mrb[11].mxu1  ;;  %v1157_v44 = vpop.f32.mrb[11].mxu0 }
 0x129   :  { %1856 = vtanh.f32 %v1153_v40 }
 0x12a   :  { %v1156_v45 = vadd.f32 %v1155_v42, %v924_v41 }
 0x12b   :  { %v1853_v46 = vpop.eup %1852 }
 0x12c   :  { %1858 = vtanh.f32 %v1156_v45  ;;  %1385 = vst [vmem:[%s2593_s3 + $0x10] sm:$0xff] %v1853_v46  ;;  %v928_v47 = vpop.f32.mrb[12].mxu1 }
 0x12d   :  { %v1855_v48 = vpop.eup %1854  ;;  %v929_v49 = vadd.f32 %v2392_v7, %v928_v47  ;;  %v1160_v50 = vpop.f32.mrb[12].mxu0 }
 0x12e   :  { %v930_v51 = vpop.f32.mrb[13].mxu1  ;;  %1386 = vst [vmem:[%s2593_s3 + $0x18] sm:$0xff] %v1855_v48  ;;  %v1162_v52 = vpop.f32.mrb[13].mxu0 }
 0x12f   :  { %v931_v53 = vpop.f32.mrb[14].mxu1  ;;  %v1161_v54 = vadd.f32 %v1160_v50, %v929_v49  ;;  %v1163_v56 = vpop.f32.mrb[14].mxu0 }
 0x130   :  { %v932_v55 = vadd.f32 %v2392_v7, %v931_v53  ;;  %v933_v57 = vpop.f32.mrb[15].mxu1  ;;  %v1165_v58 = vpop.f32.mrb[15].mxu0 }
 0x131   :  { %1860 = vtanh.f32 %v1161_v54 }
 0x132   :  { %v1164_v59 = vadd.f32 %v1163_v56, %v932_v55 }
 0x133   :  { %v1857_v60 = vpop.eup %1856 }
 0x134   :  { %1862 = vtanh.f32 %v1164_v59  ;;  %1387 = vst [vmem:[%s2593_s3 + $0x20] sm:$0xff] %v1857_v60  ;;  %v936_v61 = vpop.f32.mrb[16].mxu1 }
 0x135   :  { %v937_v63 = vadd.f32 %v2392_v7, %v936_v61  ;;  %v1168_v0 = vpop.f32.mrb[16].mxu0  ;;  %v938_v1 = vpop.f32.mrb[17].mxu1 }
 0x136   :  { %v1859_v62 = vpop.eup %1858  ;;  %v1170_v2 = vpop.f32.mrb[17].mxu0 }
 0x137   :  { %1388 = vst [vmem:[%s2593_s3 + $0x28] sm:$0xff] %v1859_v62  ;;  %v939_v3 = vpop.f32.mrb[18].mxu1  ;;  %v1169_v4 = vadd.f32 %v1168_v0, %v937_v63  ;;  %v1171_v6 = vpop.f32.mrb[18].mxu0 }
 0x138   :  { %v940_v5 = vadd.f32 %v2392_v7, %v939_v3  ;;  %v941_v8 = vpop.f32.mrb[19].mxu1  ;;  %v1173_v9 = vpop.f32.mrb[19].mxu0 }
 0x139   :  { %1864 = vtanh.f32 %v1169_v4 }
 0x13a   :  { %v1172_v10 = vadd.f32 %v1171_v6, %v940_v5 }
 0x13b   :  { %v1861_v11 = vpop.eup %1860 }
 0x13c   :  { %1866 = vtanh.f32 %v1172_v10  ;;  %1389 = vst [vmem:[%s2593_s3 + $0x30] sm:$0xff] %v1861_v11  ;;  %v944_v12 = vpop.f32.mrb[20].mxu1 }
 0x13d   :  { %v945_v14 = vadd.f32 %v2392_v7, %v944_v12  ;;  %v1176_v15 = vpop.f32.mrb[20].mxu0  ;;  %v946_v16 = vpop.f32.mrb[21].mxu1 }
 0x13e   :  { %v1863_v13 = vpop.eup %1862  ;;  %v1178_v17 = vpop.f32.mrb[21].mxu0 }
 0x13f   :  { %1390 = vst [vmem:[%s2593_s3 + $0x38] sm:$0xff] %v1863_v13  ;;  %v947_v18 = vpop.f32.mrb[22].mxu1  ;;  %v1177_v19 = vadd.f32 %v1176_v15, %v945_v14  ;;  %v1179_v21 = vpop.f32.mrb[22].mxu0 }
 0x140   :  { %v948_v20 = vadd.f32 %v2392_v7, %v947_v18  ;;  %v949_v22 = vpop.f32.mrb[23].mxu1  ;;  %v1181_v23 = vpop.f32.mrb[23].mxu0 }
 0x141   :  { %1868 = vtanh.f32 %v1177_v19 }
 0x142   :  { %v1180_v24 = vadd.f32 %v1179_v21, %v948_v20 }
 0x143   :  { %v1865_v25 = vpop.eup %1864 }
 0x144   :  { %1870 = vtanh.f32 %v1180_v24  ;;  %1391 = vst [vmem:[%s2593_s3 + $0x40] sm:$0xff] %v1865_v25  ;;  %v952_v26 = vpop.f32.mrb[24].mxu1 }
 0x145   :  { %v953_v28 = vadd.f32 %v2392_v7, %v952_v26  ;;  %v1184_v29 = vpop.f32.mrb[24].mxu0  ;;  %v954_v30 = vpop.f32.mrb[25].mxu1 }
 0x146   :  { %v1867_v27 = vpop.eup %1866  ;;  %v1186_v31 = vpop.f32.mrb[25].mxu0 }
 0x147   :  { %1392 = vst [vmem:[%s2593_s3 + $0x48] sm:$0xff] %v1867_v27  ;;  %v955_v32 = vpop.f32.mrb[26].mxu1  ;;  %v1185_v33 = vadd.f32 %v1184_v29, %v953_v28  ;;  %v1187_v35 = vpop.f32.mrb[26].mxu0 }
 0x148   :  { %v956_v34 = vadd.f32 %v2392_v7, %v955_v32  ;;  %v957_v36 = vpop.f32.mrb[27].mxu1  ;;  %v1189_v37 = vpop.f32.mrb[27].mxu0 }
 0x149   :  { %1872 = vtanh.f32 %v1185_v33 }
 0x14a   :  { %v1188_v38 = vadd.f32 %v1187_v35, %v956_v34 }
 0x14b   :  { %v1869_v39 = vpop.eup %1868 }
 0x14c   :  { %1874 = vtanh.f32 %v1188_v38  ;;  %1393 = vst [vmem:[%s2593_s3 + $0x50] sm:$0xff] %v1869_v39  ;;  %v960_v40 = vpop.f32.mrb[28].mxu1 }
 0x14d   :  { %v961_v42 = vadd.f32 %v2392_v7, %v960_v40  ;;  %v1192_v43 = vpop.f32.mrb[28].mxu0  ;;  %v962_v44 = vpop.f32.mrb[29].mxu1 }
 0x14e   :  { %v1871_v41 = vpop.eup %1870  ;;  %v1194_v45 = vpop.f32.mrb[29].mxu0 }
 0x14f   :  { %1394 = vst [vmem:[%s2593_s3 + $0x58] sm:$0xff] %v1871_v41  ;;  %v963_v46 = vpop.f32.mrb[30].mxu1  ;;  %v1193_v47 = vadd.f32 %v1192_v43, %v961_v42  ;;  %v1195_v49 = vpop.f32.mrb[30].mxu0 }
 0x150   :  { %v964_v48 = vadd.f32 %v2392_v7, %v963_v46  ;;  %v965_v50 = vpop.f32.mrb[31].mxu1  ;;  %v1197_v51 = vpop.f32.mrb[31].mxu0 }
 0x151   :  { %1876 = vtanh.f32 %v1193_v47 }
 0x152   :  { %v1196_v52 = vadd.f32 %v1195_v49, %v964_v48 }
 0x153   :  { %v1873_v53 = vpop.eup %1872 }
 0x154   :  { %1878 = vtanh.f32 %v1196_v52  ;;  %1395 = vst [vmem:[%s2593_s3 + $0x60] sm:$0xff] %v1873_v53  ;;  %v968_v54 = vpop.f32.mrb[32].mxu1 }
 0x155   :  { %v969_v56 = vadd.f32 %v2392_v7, %v968_v54  ;;  %v1200_v57 = vpop.f32.mrb[32].mxu0  ;;  %v970_v58 = vpop.f32.mrb[33].mxu1 }
 0x156   :  { %v1875_v55 = vpop.eup %1874  ;;  %v1202_v59 = vpop.f32.mrb[33].mxu0 }
 0x157   :  { %1396 = vst [vmem:[%s2593_s3 + $0x68] sm:$0xff] %v1875_v55  ;;  %v971_v60 = vpop.f32.mrb[34].mxu1  ;;  %v1201_v61 = vadd.f32 %v1200_v57, %v969_v56  ;;  %v1203_v63 = vpop.f32.mrb[34].mxu0 }
 0x158   :  { %v972_v62 = vadd.f32 %v2392_v7, %v971_v60  ;;  %v973_v0 = vpop.f32.mrb[35].mxu1  ;;  %v1205_v1 = vpop.f32.mrb[35].mxu0 }
 0x159   :  { %1880 = vtanh.f32 %v1201_v61 }
 0x15a   :  { %v1204_v2 = vadd.f32 %v1203_v63, %v972_v62 }
 0x15b   :  { %v1877_v3 = vpop.eup %1876 }
 0x15c   :  { %1882 = vtanh.f32 %v1204_v2  ;;  %1397 = vst [vmem:[%s2593_s3 + $0x70] sm:$0xff] %v1877_v3  ;;  %v976_v4 = vpop.f32.mrb[36].mxu1 }
 0x15d   :  { %v977_v6 = vadd.f32 %v2392_v7, %v976_v4  ;;  %v1208_v8 = vpop.f32.mrb[36].mxu0  ;;  %v978_v9 = vpop.f32.mrb[37].mxu1 }
 0x15e   :  { %v1879_v5 = vpop.eup %1878  ;;  %v1210_v10 = vpop.f32.mrb[37].mxu0 }
 0x15f   :  { %1398 = vst [vmem:[%s2593_s3 + $0x78] sm:$0xff] %v1879_v5  ;;  %v979_v11 = vpop.f32.mrb[38].mxu1  ;;  %v1209_v12 = vadd.f32 %v1208_v8, %v977_v6  ;;  %v1211_v14 = vpop.f32.mrb[38].mxu0 }
 0x160   :  { %v980_v13 = vadd.f32 %v2392_v7, %v979_v11  ;;  %v981_v15 = vpop.f32.mrb[39].mxu1  ;;  %v1213_v16 = vpop.f32.mrb[39].mxu0 }
 0x161   :  { %1884 = vtanh.f32 %v1209_v12 }
 0x162   :  { %v1212_v17 = vadd.f32 %v1211_v14, %v980_v13 }
 0x163   :  { %v1881_v18 = vpop.eup %1880 }
 0x164   :  { %1886 = vtanh.f32 %v1212_v17  ;;  %1399 = vst [vmem:[%s2593_s3 + $0x80] sm:$0xff] %v1881_v18  ;;  %v984_v19 = vpop.f32.mrb[40].mxu1 }
 0x165   :  { %v985_v21 = vadd.f32 %v2392_v7, %v984_v19  ;;  %v1216_v22 = vpop.f32.mrb[40].mxu0  ;;  %v986_v23 = vpop.f32.mrb[41].mxu1 }
 0x166   :  { %v1883_v20 = vpop.eup %1882  ;;  %v1218_v24 = vpop.f32.mrb[41].mxu0 }
 0x167   :  { %1400 = vst [vmem:[%s2593_s3 + $0x88] sm:$0xff] %v1883_v20  ;;  %v987_v25 = vpop.f32.mrb[42].mxu1  ;;  %v1217_v26 = vadd.f32 %v1216_v22, %v985_v21  ;;  %v1219_v28 = vpop.f32.mrb[42].mxu0 }
 0x168   :  { %v988_v27 = vadd.f32 %v2392_v7, %v987_v25  ;;  %v989_v29 = vpop.f32.mrb[43].mxu1  ;;  %v1221_v30 = vpop.f32.mrb[43].mxu0 }
 0x169   :  { %1888 = vtanh.f32 %v1217_v26 }
 0x16a   :  { %v1220_v31 = vadd.f32 %v1219_v28, %v988_v27 }
 0x16b   :  { %v1885_v32 = vpop.eup %1884 }
 0x16c   :  { %1890 = vtanh.f32 %v1220_v31  ;;  %1401 = vst [vmem:[%s2593_s3 + $0x90] sm:$0xff] %v1885_v32  ;;  %v992_v33 = vpop.f32.mrb[44].mxu1 }
 0x16d   :  { %v993_v35 = vadd.f32 %v2392_v7, %v992_v33  ;;  %v1224_v36 = vpop.f32.mrb[44].mxu0  ;;  %v994_v37 = vpop.f32.mrb[45].mxu1 }
 0x16e   :  { %v1887_v34 = vpop.eup %1886  ;;  %v1226_v38 = vpop.f32.mrb[45].mxu0 }
 0x16f   :  { %1402 = vst [vmem:[%s2593_s3 + $0x98] sm:$0xff] %v1887_v34  ;;  %v995_v39 = vpop.f32.mrb[46].mxu1  ;;  %v1225_v40 = vadd.f32 %v1224_v36, %v993_v35  ;;  %v1227_v42 = vpop.f32.mrb[46].mxu0 }
 0x170   :  { %v996_v41 = vadd.f32 %v2392_v7, %v995_v39  ;;  %v997_v43 = vpop.f32.mrb[47].mxu1  ;;  %v1229_v44 = vpop.f32.mrb[47].mxu0 }
 0x171   :  { %1892 = vtanh.f32 %v1225_v40 }
 0x172   :  { %v1228_v45 = vadd.f32 %v1227_v42, %v996_v41 }
 0x173   :  { %v1889_v46 = vpop.eup %1888 }
 0x174   :  { %1894 = vtanh.f32 %v1228_v45  ;;  %1403 = vst [vmem:[%s2593_s3 + $0xa0] sm:$0xff] %v1889_v46  ;;  %v1000_v47 = vpop.f32.mrb[48].mxu1 }
 0x175   :  { %v1001_v49 = vadd.f32 %v2392_v7, %v1000_v47  ;;  %v1232_v50 = vpop.f32.mrb[48].mxu0  ;;  %v1002_v51 = vpop.f32.mrb[49].mxu1 }
 0x176   :  { %v1891_v48 = vpop.eup %1890  ;;  %v1234_v52 = vpop.f32.mrb[49].mxu0 }
 0x177   :  { %1404 = vst [vmem:[%s2593_s3 + $0xa8] sm:$0xff] %v1891_v48  ;;  %v1003_v53 = vpop.f32.mrb[50].mxu1  ;;  %v1233_v54 = vadd.f32 %v1232_v50, %v1001_v49  ;;  %v1235_v56 = vpop.f32.mrb[50].mxu0 }
 0x178   :  { %v1004_v55 = vadd.f32 %v2392_v7, %v1003_v53  ;;  %v1005_v57 = vpop.f32.mrb[51].mxu1  ;;  %v1237_v58 = vpop.f32.mrb[51].mxu0 }
 0x179   :  { %1896 = vtanh.f32 %v1233_v54 }
 0x17a   :  { %v1236_v59 = vadd.f32 %v1235_v56, %v1004_v55 }
 0x17b   :  { %v1893_v60 = vpop.eup %1892 }
 0x17c   :  { %1898 = vtanh.f32 %v1236_v59  ;;  %1405 = vst [vmem:[%s2593_s3 + $0xb0] sm:$0xff] %v1893_v60  ;;  %v1008_v61 = vpop.f32.mrb[52].mxu1 }
 0x17d   :  { %v1009_v63 = vadd.f32 %v2392_v7, %v1008_v61  ;;  %v1240_v0 = vpop.f32.mrb[52].mxu0  ;;  %v1010_v1 = vpop.f32.mrb[53].mxu1 }
 0x17e   :  { %v1895_v62 = vpop.eup %1894  ;;  %v1242_v2 = vpop.f32.mrb[53].mxu0 }
 0x17f   :  { %1406 = vst [vmem:[%s2593_s3 + $0xb8] sm:$0xff] %v1895_v62  ;;  %v1011_v3 = vpop.f32.mrb[54].mxu1  ;;  %v1241_v4 = vadd.f32 %v1240_v0, %v1009_v63  ;;  %v1243_v6 = vpop.f32.mrb[54].mxu0 }
 0x180   :  { %v1012_v5 = vadd.f32 %v2392_v7, %v1011_v3  ;;  %v1013_v8 = vpop.f32.mrb[55].mxu1  ;;  %v1245_v9 = vpop.f32.mrb[55].mxu0 }
 0x181   :  { %1900 = vtanh.f32 %v1241_v4 }
 0x182   :  { %v1244_v10 = vadd.f32 %v1243_v6, %v1012_v5 }
 0x183   :  { %v1897_v11 = vpop.eup %1896 }
 0x184   :  { %1902 = vtanh.f32 %v1244_v10  ;;  %1407 = vst [vmem:[%s2593_s3 + $0xc0] sm:$0xff] %v1897_v11  ;;  %v1016_v12 = vpop.f32.mrb[56].mxu1 }
 0x185   :  { %v1017_v14 = vadd.f32 %v2392_v7, %v1016_v12  ;;  %v1248_v15 = vpop.f32.mrb[56].mxu0  ;;  %v1018_v16 = vpop.f32.mrb[57].mxu1 }
 0x186   :  { %v1899_v13 = vpop.eup %1898  ;;  %v1250_v17 = vpop.f32.mrb[57].mxu0 }
 0x187   :  { %1408 = vst [vmem:[%s2593_s3 + $0xc8] sm:$0xff] %v1899_v13  ;;  %v1019_v18 = vpop.f32.mrb[58].mxu1  ;;  %v1249_v19 = vadd.f32 %v1248_v15, %v1017_v14  ;;  %v1251_v21 = vpop.f32.mrb[58].mxu0 }
 0x188   :  { %v1020_v20 = vadd.f32 %v2392_v7, %v1019_v18  ;;  %v1021_v22 = vpop.f32.mrb[59].mxu1  ;;  %v1253_v23 = vpop.f32.mrb[59].mxu0 }
 0x189   :  { %1904 = vtanh.f32 %v1249_v19 }
 0x18a   :  { %v1252_v24 = vadd.f32 %v1251_v21, %v1020_v20 }
 0x18b   :  { %v1901_v25 = vpop.eup %1900 }
 0x18c   :  { %1906 = vtanh.f32 %v1252_v24  ;;  %1409 = vst [vmem:[%s2593_s3 + $0xd0] sm:$0xff] %v1901_v25  ;;  %v1024_v26 = vpop.f32.mrb[60].mxu1 }
 0x18d   :  { %v1025_v28 = vadd.f32 %v2392_v7, %v1024_v26  ;;  %v1256_v29 = vpop.f32.mrb[60].mxu0  ;;  %v1026_v30 = vpop.f32.mrb[61].mxu1 }
 0x18e   :  { %v1903_v27 = vpop.eup %1902  ;;  %v1258_v31 = vpop.f32.mrb[61].mxu0 }
 0x18f   :  { %1410 = vst [vmem:[%s2593_s3 + $0xd8] sm:$0xff] %v1903_v27  ;;  %v1027_v32 = vpop.f32.mrb[62].mxu1  ;;  %v1257_v33 = vadd.f32 %v1256_v29, %v1025_v28  ;;  %v1259_v35 = vpop.f32.mrb[62].mxu0 }
 0x190   :  { %v1028_v34 = vadd.f32 %v2392_v7, %v1027_v32  ;;  %v1029_v36 = vpop.f32.mrb[63].mxu1  ;;  %v1261_v37 = vpop.f32.mrb[63].mxu0 }
 0x191   :  { %1908 = vtanh.f32 %v1257_v33 }
 0x192   :  { %v1260_v38 = vadd.f32 %v1259_v35, %v1028_v34 }
 0x193   :  { %v1905_v39 = vpop.eup %1904 }
 0x194   :  { %1910 = vtanh.f32 %v1260_v38  ;;  %1411 = vst [vmem:[%s2593_s3 + $0xe0] sm:$0xff] %v1905_v39  ;;  %v1032_v40 = vpop.f32.mrb[64].mxu1 }
 0x195   :  { %v1033_v42 = vadd.f32 %v2392_v7, %v1032_v40  ;;  %v1264_v43 = vpop.f32.mrb[64].mxu0  ;;  %v1034_v44 = vpop.f32.mrb[65].mxu1 }
 0x196   :  { %v1907_v41 = vpop.eup %1906  ;;  %v1266_v45 = vpop.f32.mrb[65].mxu0 }
 0x197   :  { %1412 = vst [vmem:[%s2593_s3 + $0xe8] sm:$0xff] %v1907_v41  ;;  %v1035_v46 = vpop.f32.mrb[66].mxu1  ;;  %v1265_v47 = vadd.f32 %v1264_v43, %v1033_v42  ;;  %v1267_v49 = vpop.f32.mrb[66].mxu0 }
 0x198   :  { %v1036_v48 = vadd.f32 %v2392_v7, %v1035_v46  ;;  %v1037_v50 = vpop.f32.mrb[67].mxu1  ;;  %v1269_v51 = vpop.f32.mrb[67].mxu0 }
 0x199   :  { %1912 = vtanh.f32 %v1265_v47 }
 0x19a   :  { %v1268_v52 = vadd.f32 %v1267_v49, %v1036_v48 }
 0x19b   :  { %v1909_v53 = vpop.eup %1908 }
 0x19c   :  { %1914 = vtanh.f32 %v1268_v52  ;;  %1413 = vst [vmem:[%s2593_s3 + $0xf0] sm:$0xff] %v1909_v53  ;;  %v1040_v54 = vpop.f32.mrb[68].mxu1 }
 0x19d   :  { %v1041_v56 = vadd.f32 %v2392_v7, %v1040_v54  ;;  %v1272_v57 = vpop.f32.mrb[68].mxu0  ;;  %v1042_v58 = vpop.f32.mrb[69].mxu1 }
 0x19e   :  { %v1911_v55 = vpop.eup %1910  ;;  %v1274_v59 = vpop.f32.mrb[69].mxu0 }
 0x19f   :  { %1414 = vst [vmem:[%s2593_s3 + $0xf8] sm:$0xff] %v1911_v55  ;;  %v1043_v60 = vpop.f32.mrb[70].mxu1  ;;  %v1273_v61 = vadd.f32 %v1272_v57, %v1041_v56  ;;  %v1275_v63 = vpop.f32.mrb[70].mxu0 }
 0x1a0   :  { %v1044_v62 = vadd.f32 %v2392_v7, %v1043_v60  ;;  %v1045_v0 = vpop.f32.mrb[71].mxu1  ;;  %v1277_v1 = vpop.f32.mrb[71].mxu0 }
 0x1a1   :  { %1916 = vtanh.f32 %v1273_v61 }
 0x1a2   :  { %v1276_v2 = vadd.f32 %v1275_v63, %v1044_v62 }
 0x1a3   :  { %v1913_v3 = vpop.eup %1912 }
 0x1a4   :  { %1918 = vtanh.f32 %v1276_v2  ;;  %1415 = vst [vmem:[%s2593_s3 + $0x100] sm:$0xff] %v1913_v3  ;;  %v1048_v4 = vpop.f32.mrb[72].mxu1 }
 0x1a5   :  { %v1049_v6 = vadd.f32 %v2392_v7, %v1048_v4  ;;  %v1280_v8 = vpop.f32.mrb[72].mxu0  ;;  %v1050_v9 = vpop.f32.mrb[73].mxu1 }
 0x1a6   :  { %v1915_v5 = vpop.eup %1914  ;;  %v1282_v10 = vpop.f32.mrb[73].mxu0 }
 0x1a7   :  { %1416 = vst [vmem:[%s2593_s3 + $0x108] sm:$0xff] %v1915_v5  ;;  %v1051_v11 = vpop.f32.mrb[74].mxu1  ;;  %v1281_v12 = vadd.f32 %v1280_v8, %v1049_v6  ;;  %v1283_v14 = vpop.f32.mrb[74].mxu0 }
 0x1a8   :  { %v1052_v13 = vadd.f32 %v2392_v7, %v1051_v11  ;;  %v1053_v15 = vpop.f32.mrb[75].mxu1  ;;  %v1285_v16 = vpop.f32.mrb[75].mxu0 }
 0x1a9   :  { %1920 = vtanh.f32 %v1281_v12 }
 0x1aa   :  { %v1284_v17 = vadd.f32 %v1283_v14, %v1052_v13 }
 0x1ab   :  { %v1917_v18 = vpop.eup %1916 }
 0x1ac   :  { %1922 = vtanh.f32 %v1284_v17  ;;  %1417 = vst [vmem:[%s2593_s3 + $0x110] sm:$0xff] %v1917_v18  ;;  %v1056_v19 = vpop.f32.mrb[76].mxu1 }
 0x1ad   :  { %v1057_v21 = vadd.f32 %v2392_v7, %v1056_v19  ;;  %v1288_v22 = vpop.f32.mrb[76].mxu0  ;;  %v1058_v23 = vpop.f32.mrb[77].mxu1 }
 0x1ae   :  { %v1919_v20 = vpop.eup %1918  ;;  %v1290_v24 = vpop.f32.mrb[77].mxu0 }
 0x1af   :  { %1418 = vst [vmem:[%s2593_s3 + $0x118] sm:$0xff] %v1919_v20  ;;  %v1059_v25 = vpop.f32.mrb[78].mxu1  ;;  %v1289_v26 = vadd.f32 %v1288_v22, %v1057_v21  ;;  %v1291_v28 = vpop.f32.mrb[78].mxu0 }
 0x1b0   :  { %v1060_v27 = vadd.f32 %v2392_v7, %v1059_v25  ;;  %v1061_v29 = vpop.f32.mrb[79].mxu1  ;;  %v1293_v30 = vpop.f32.mrb[79].mxu0 }
 0x1b1   :  { %1924 = vtanh.f32 %v1289_v26 }
 0x1b2   :  { %v1292_v31 = vadd.f32 %v1291_v28, %v1060_v27 }
 0x1b3   :  { %v1921_v32 = vpop.eup %1920 }
 0x1b4   :  { %1926 = vtanh.f32 %v1292_v31  ;;  %1419 = vst [vmem:[%s2593_s3 + $0x120] sm:$0xff] %v1921_v32  ;;  %v1064_v33 = vpop.f32.mrb[80].mxu1 }
 0x1b5   :  { %v1065_v35 = vadd.f32 %v2392_v7, %v1064_v33  ;;  %v1296_v36 = vpop.f32.mrb[80].mxu0  ;;  %v1066_v37 = vpop.f32.mrb[81].mxu1 }
 0x1b6   :  { %v1923_v34 = vpop.eup %1922  ;;  %v1298_v38 = vpop.f32.mrb[81].mxu0 }
 0x1b7   :  { %1420 = vst [vmem:[%s2593_s3 + $0x128] sm:$0xff] %v1923_v34  ;;  %v1067_v39 = vpop.f32.mrb[82].mxu1  ;;  %v1297_v40 = vadd.f32 %v1296_v36, %v1065_v35  ;;  %v1299_v42 = vpop.f32.mrb[82].mxu0 }
 0x1b8   :  { %v1068_v41 = vadd.f32 %v2392_v7, %v1067_v39  ;;  %v1069_v43 = vpop.f32.mrb[83].mxu1  ;;  %v1301_v44 = vpop.f32.mrb[83].mxu0 }
 0x1b9   :  { %1928 = vtanh.f32 %v1297_v40 }
 0x1ba   :  { %v1300_v45 = vadd.f32 %v1299_v42, %v1068_v41 }
 0x1bb   :  { %v1925_v46 = vpop.eup %1924 }
 0x1bc   :  { %1930 = vtanh.f32 %v1300_v45  ;;  %1421 = vst [vmem:[%s2593_s3 + $0x130] sm:$0xff] %v1925_v46  ;;  %v1072_v47 = vpop.f32.mrb[84].mxu1 }
 0x1bd   :  { %v1073_v49 = vadd.f32 %v2392_v7, %v1072_v47  ;;  %v1304_v50 = vpop.f32.mrb[84].mxu0  ;;  %v1074_v51 = vpop.f32.mrb[85].mxu1 }
 0x1be   :  { %v1927_v48 = vpop.eup %1926  ;;  %v1306_v52 = vpop.f32.mrb[85].mxu0 }
 0x1bf   :  { %1422 = vst [vmem:[%s2593_s3 + $0x138] sm:$0xff] %v1927_v48  ;;  %v1075_v53 = vpop.f32.mrb[86].mxu1  ;;  %v1305_v54 = vadd.f32 %v1304_v50, %v1073_v49  ;;  %v1307_v56 = vpop.f32.mrb[86].mxu0 }
 0x1c0   :  { %v1076_v55 = vadd.f32 %v2392_v7, %v1075_v53  ;;  %v1077_v57 = vpop.f32.mrb[87].mxu1  ;;  %v1309_v58 = vpop.f32.mrb[87].mxu0 }
 0x1c1   :  { %1932 = vtanh.f32 %v1305_v54 }
 0x1c2   :  { %v1308_v59 = vadd.f32 %v1307_v56, %v1076_v55 }
 0x1c3   :  { %v1929_v60 = vpop.eup %1928 }
 0x1c4   :  { %1934 = vtanh.f32 %v1308_v59  ;;  %1423 = vst [vmem:[%s2593_s3 + $0x140] sm:$0xff] %v1929_v60  ;;  %v1080_v61 = vpop.f32.mrb[88].mxu1 }
 0x1c5   :  { %v1081_v63 = vadd.f32 %v2392_v7, %v1080_v61  ;;  %v1312_v0 = vpop.f32.mrb[88].mxu0  ;;  %v1082_v1 = vpop.f32.mrb[89].mxu1 }
 0x1c6   :  { %v1931_v62 = vpop.eup %1930  ;;  %v1314_v2 = vpop.f32.mrb[89].mxu0 }
 0x1c7   :  { %1424 = vst [vmem:[%s2593_s3 + $0x148] sm:$0xff] %v1931_v62  ;;  %v1083_v3 = vpop.f32.mrb[90].mxu1  ;;  %v1313_v4 = vadd.f32 %v1312_v0, %v1081_v63  ;;  %v1315_v6 = vpop.f32.mrb[90].mxu0 }
 0x1c8   :  { %v1084_v5 = vadd.f32 %v2392_v7, %v1083_v3  ;;  %v1085_v8 = vpop.f32.mrb[91].mxu1  ;;  %v1317_v9 = vpop.f32.mrb[91].mxu0 }
 0x1c9   :  { %1936 = vtanh.f32 %v1313_v4 }
 0x1ca   :  { %v1316_v10 = vadd.f32 %v1315_v6, %v1084_v5 }
 0x1cb   :  { %v1933_v11 = vpop.eup %1932 }
 0x1cc   :  { %1938 = vtanh.f32 %v1316_v10  ;;  %1425 = vst [vmem:[%s2593_s3 + $0x150] sm:$0xff] %v1933_v11  ;;  %v1088_v12 = vpop.f32.mrb[92].mxu1 }
 0x1cd   :  { %v1089_v14 = vadd.f32 %v2392_v7, %v1088_v12  ;;  %v1320_v15 = vpop.f32.mrb[92].mxu0  ;;  %v1090_v16 = vpop.f32.mrb[93].mxu1 }
 0x1ce   :  { %v1935_v13 = vpop.eup %1934  ;;  %v1322_v17 = vpop.f32.mrb[93].mxu0 }
 0x1cf   :  { %1426 = vst [vmem:[%s2593_s3 + $0x158] sm:$0xff] %v1935_v13  ;;  %v1091_v18 = vpop.f32.mrb[94].mxu1  ;;  %v1321_v19 = vadd.f32 %v1320_v15, %v1089_v14  ;;  %v1323_v21 = vpop.f32.mrb[94].mxu0 }
 0x1d0   :  { %v1092_v20 = vadd.f32 %v2392_v7, %v1091_v18  ;;  %v1093_v22 = vpop.f32.mrb[95].mxu1  ;;  %v1325_v23 = vpop.f32.mrb[95].mxu0 }
 0x1d1   :  { %1940 = vtanh.f32 %v1321_v19 }
 0x1d2   :  { %v1324_v24 = vadd.f32 %v1323_v21, %v1092_v20 }
 0x1d3   :  { %v1937_v25 = vpop.eup %1936 }
 0x1d4   :  { %1942 = vtanh.f32 %v1324_v24  ;;  %1427 = vst [vmem:[%s2593_s3 + $0x160] sm:$0xff] %v1937_v25  ;;  %v1096_v26 = vpop.f32.mrb[96].mxu1 }
 0x1d5   :  { %v1097_v28 = vadd.f32 %v2392_v7, %v1096_v26  ;;  %v1328_v29 = vpop.f32.mrb[96].mxu0  ;;  %v1098_v30 = vpop.f32.mrb[97].mxu1 }
 0x1d6   :  { %v1939_v27 = vpop.eup %1938  ;;  %v1330_v31 = vpop.f32.mrb[97].mxu0 }
 0x1d7   :  { %1428 = vst [vmem:[%s2593_s3 + $0x168] sm:$0xff] %v1939_v27  ;;  %v1099_v32 = vpop.f32.mrb[98].mxu1  ;;  %v1329_v33 = vadd.f32 %v1328_v29, %v1097_v28  ;;  %v1331_v34 = vpop.f32.mrb[98].mxu0 }
 0x1d8   :  { %v1100_v35 = vpop.f32.mrb[99].mxu1  ;;  %v1332_v36 = vpop.f32.mrb[99].mxu0 }
 0x1d9   :  { %1944 = vtanh.f32 %v1329_v33 }
 0x1db   :  { %v1941_v37 = vpop.eup %1940 }
 0x1dc   :  { %1429 = vst [vmem:[%s2593_s3 + $0x170] sm:$0xff] %v1941_v37 }
 0x1de   :  { %v1943_v38 = vpop.eup %1942 }
 0x1df   :  { %1430 = vst [vmem:[%s2593_s3 + $0x178] sm:$0xff] %v1943_v38 }
 0x1e3   :  { %v1945_v7 = vpop.eup %1944 }
 0x1e4   :  { %1431 = vst [vmem:[%s2593_s3 + $0x180] sm:$0xff] %v1945_v7 }

</bundles_post_ra>
